<compile_context>
chip_gen: v6e
topology: v6e:2x2x1
jax: 0.10.0
libtpu: 0.0.40
codegen_flags: <defaults>
</compile_context>

<pallas_src>
import functools

import jax
import jax.numpy as jnp
import numpy as np
from jax import lax
from jax.experimental import pallas as pl
from jax.experimental.pallas import tpu as pltpu


_SQRT_2_OVER_PI = 0.7978845608028654


def _gelu_tanh(x):
    # tanh-approximate GELU (PyTorch nn.GELU(approximate='tanh')).  jnp.tanh runs on the EUP
    # slot, replacing ~10 VALU mul/adds per element of the erf polynomial used previously.
    return 0.5 * x * (1.0 + jnp.tanh(_SQRT_2_OVER_PI * (x + 0.044715 * (x * x * x))))


def _encoder_layer_kernel(
    x_ref,
    wq_ref, bq_ref, wk_ref, bk_ref, wv_ref, bv_ref, wo_ref, bo_ref,
    w1_ref, bf1_ref, w2_ref, bf2_ref,
    g1_ref, be1_ref, g2_ref, be2_ref,
    out_ref,
    *, B, S, D, H, DH, eps,
):
    f32 = jnp.float32
    bf16 = jnp.bfloat16
    HB = H * B
    N = B * S

    x3 = x_ref[...].astype(f32)                            # [B, S, D]
    xf = x3.reshape(N, D)                                  # [N, D] residual (f32)

    # Replicate activations across heads along the LEADING (major) axis so every attention
    # matmul below is a single leading-batch dot_general over the fused (H*B) axis.
    # (Major-axis concat only; the (sublane, lane) layout of each [S, D] tile is untouched.)
    x_hb = jnp.concatenate([x3.astype(bf16)] * H, axis=0)  # [H*B, S, D], index h*B + b

    wq = wq_ref[...].astype(bf16)                          # [H*B, D, DH]
    wk = wk_ref[...].astype(bf16)
    wv = wv_ref[...].astype(bf16)
    wo = wo_ref[...].astype(bf16)                          # [H*B, DH, D]

    # ---- Q/K/V projections: batched over (head, batch); bf16 in, f32 accumulate ----
    q = jnp.einsum('bsd,bde->bse', x_hb, wq, preferred_element_type=f32) + bq_ref[...]
    k = jnp.einsum('bsd,bde->bse', x_hb, wk, preferred_element_type=f32) + bk_ref[...]
    v = jnp.einsum('bsd,bde->bse', x_hb, wv, preferred_element_type=f32) + bv_ref[...]

    # ---- scaled dot-product attention: leading-batch contractions, no transposes ----
    scale = 1.0 / float(np.sqrt(DH))
    s = jnp.einsum('bqd,bkd->bqk', (q * scale).astype(bf16), k.astype(bf16),
                   preferred_element_type=f32)             # [H*B, S, S]
    s = s - jnp.max(s, axis=-1, keepdims=True)
    e = jnp.exp(s)
    p = e * pl.reciprocal(jnp.sum(e, axis=-1, keepdims=True), approx=True)
    ctx = jnp.einsum('bqk,bkd->bqd', p.astype(bf16), v.astype(bf16),
                     preferred_element_type=f32)           # [H*B, S, DH]

    # ---- output projection folded per head, then reduced over the head axis ----
    att = jnp.einsum('bsd,bde->bse', ctx.astype(bf16), wo,
                     preferred_element_type=f32)           # [H*B, S, D]
    att4 = att.reshape(H, B, S, D)                         # leading-dim split (layout no-op)
    attended3 = att4[0]
    for h in range(1, H):                                  # H-1 cheap VALU adds
        attended3 = attended3 + att4[h]
    attended = attended3.reshape(N, D) + bo_ref[...]

    # ---- residual + BatchNorm #1 (training-mode batch stats, biased variance) ----
    y = xf + attended
    m1 = jnp.mean(y, axis=0, keepdims=True)
    d1 = y - m1
    v1 = jnp.mean(d1 * d1, axis=0, keepdims=True)
    yn = d1 * lax.rsqrt(v1 + eps) * g1_ref[...] + be1_ref[...]

    # ---- position-wise feed-forward (bf16 MXU inputs, tanh GELU on the EUP) ----
    h1 = jnp.dot(yn.astype(bf16), w1_ref[...].astype(bf16),
                 preferred_element_type=f32) + bf1_ref[...]
    h1 = _gelu_tanh(h1)
    f = jnp.dot(h1.astype(bf16), w2_ref[...].astype(bf16),
                preferred_element_type=f32) + bf2_ref[...]

    # ---- residual + BatchNorm #2 ----
    z = yn + f
    m2 = jnp.mean(z, axis=0, keepdims=True)
    d2 = z - m2
    v2 = jnp.mean(d2 * d2, axis=0, keepdims=True)
    zn = d2 * lax.rsqrt(v2 + eps) * g2_ref[...] + be2_ref[...]

    # TODO(synk): BatchNorm running-mean/var buffer updates (a training-time side effect)
    # are not produced here; the forward output does not depend on them.
    out_ref[...] = zn.reshape(B, S, D).astype(out_ref.dtype)


def tst_encoder_layer(x, params, *, num_heads, eps=1e-5):
    """Pallas TSTEncoderLayer.forward.  Returns (output, scores) with scores=None
    (residual_attention=False); dropout_rate=0.0 so all dropouts are identity."""
    B, S, D = x.shape
    H = num_heads
    DH = D // H

    # Wrapper-side layout plumbing (plain XLA, negligible cost): split the fused head
    # dimension of the attention weights into per-head slabs and replicate them across the
    # batch, so the kernel only sees leading-batch [H*B, ...] operands and never has to
    # reshape/transpose the lane dimension.  Weight tensors are tiny, so the B-fold
    # replication is noise; for very large batches, grid over batch instead (with a
    # separate BN-statistics pass).
    def heads_cols(w):    # [D, H*DH] -> [H*B, D, DH]
        return jnp.repeat(jnp.transpose(w.reshape(D, H, DH), (1, 0, 2)), B, axis=0)

    def heads_bias(b):    # [1, H*DH] -> [H*B, 1, DH]
        return jnp.repeat(jnp.transpose(b.reshape(1, H, DH), (1, 0, 2)), B, axis=0)

    def heads_rows(w):    # [H*DH, D] -> [H*B, DH, D]
        return jnp.repeat(w.reshape(H, DH, D), B, axis=0)

    flat = [
        heads_cols(params["wq"]), heads_bias(params["bq"]),
        heads_cols(params["wk"]), heads_bias(params["bk"]),
        heads_cols(params["wv"]), heads_bias(params["bv"]),
        heads_rows(params["wo"]), params["bo"],
        params["w1"], params["bf1"], params["w2"], params["bf2"],
        params["g1"], params["be1"], params["g2"], params["be2"],
    ]

    kern = functools.partial(_encoder_layer_kernel, B=B, S=S, D=D, H=H, DH=DH, eps=eps)
    out = pl.pallas_call(
        kern,
        out_shape=jax.ShapeDtypeStruct((B, S, D), jnp.float32),
        in_specs=[pl.BlockSpec(memory_space=pltpu.MemorySpace.VMEM)] * (1 + len(flat)),
        out_specs=pl.BlockSpec(memory_space=pltpu.MemorySpace.VMEM),
    )(x, *flat)
    # residual_attention=False -> scores is None.
    return out, None


def tst_encoder_layer_ref(x, params, *, num_heads, eps=1e-5):
    """Pure-JAX (f32) reference of the same forward pass, for a sanity check."""
    B, S, D = x.shape
    H = num_heads
    DH = D // H
    xf = x.reshape(B * S, D).astype(jnp.float32)
    q = xf @ params["wq"] + params["bq"]
    k = xf @ params["wk"] + params["bk"]
    v = xf @ params["wv"] + params["bv"]

    def split(t):
        return t.reshape(B, S, H, DH).transpose(0, 2, 1, 3)   # [B, H, S, DH]

    qh, kh, vh = split(q), split(k), split(v)
    s = jnp.einsum("bhqd,bhkd->bhqk", qh, kh) / np.sqrt(DH)
    p = jax.nn.softmax(s, axis=-1)
    ctx = jnp.einsum("bhqk,bhkd->bhqd", p, vh).transpose(0, 2, 1, 3).reshape(B * S, D)
    attended = ctx @ params["wo"] + params["bo"]

    def bn(t, g, b):
        m = jnp.mean(t, axis=0, keepdims=True)
        var = jnp.mean((t - m) ** 2, axis=0, keepdims=True)
        return (t - m) * jax.lax.rsqrt(var + eps) * g + b

    y = bn(xf + attended, params["g1"], params["be1"])
    h1 = _gelu_tanh(y @ params["w1"] + params["bf1"])
    z = bn(y + h1 @ params["w2"] + params["bf2"], params["g2"], params["be2"])
    return z.reshape(B, S, D)


def init_params(key, D, FF):
    ks = jax.random.split(key, 12)

    def lin(k, fan_in, shape):
        bound = 1.0 / np.sqrt(fan_in)
        return jax.random.uniform(k, shape, jnp.float32, -bound, bound)

    return dict(
        wq=lin(ks[0], D, (D, D)),   bq=lin(ks[1], D, (1, D)),
        wk=lin(ks[2], D, (D, D)),   bk=lin(ks[3], D, (1, D)),
        wv=lin(ks[4], D, (D, D)),   bv=lin(ks[5], D, (1, D)),
        wo=lin(ks[6], D, (D, D)),   bo=lin(ks[7], D, (1, D)),
        w1=lin(ks[8], D, (D, FF)),  bf1=lin(ks[9], D, (1, FF)),
        w2=lin(ks[10], FF, (FF, D)), bf2=lin(ks[11], FF, (1, D)),
        g1=jnp.ones((1, D), jnp.float32), be1=jnp.zeros((1, D), jnp.float32),
        g2=jnp.ones((1, D), jnp.float32), be2=jnp.zeros((1, D), jnp.float32),
    )


if __name__ == "__main__":
    B, S, D, H, FF = 2, 8, 32, 4, 64
    key = jax.random.PRNGKey(0)
    kx, kp = jax.random.split(key)
    x = jax.random.normal(kx, (B, S, D), dtype=jnp.float32)
    params = init_params(kp, D, FF)

    out, scores = tst_encoder_layer(x, params, num_heads=H)
    out = jax.block_until_ready(out)
    assert scores is None

    ref = jax.block_until_ready(tst_encoder_layer_ref(x, params, num_heads=H))
    # Tolerance covers the documented bf16-input matmuls + EUP approx reciprocal / tanh GELU;
    # a genuine structural bug would produce O(1) errors on these BN-normalized outputs.
    np.testing.assert_allclose(np.asarray(out), np.asarray(ref), atol=2e-2, rtol=2e-2)

    print("KERNEL_OK")
</pallas_src>

<mosaic_0001>
module attributes {stable_mosaic.version = 11 : i64} {
  func.func @_encoder_layer_kernel(%arg0: memref<2x8x32xf32, #tpu.memory_space<vmem>>, %arg1: memref<8x32x8xf32, #tpu.memory_space<vmem>>, %arg2: memref<8x1x8xf32, #tpu.memory_space<vmem>>, %arg3: memref<8x32x8xf32, #tpu.memory_space<vmem>>, %arg4: memref<8x1x8xf32, #tpu.memory_space<vmem>>, %arg5: memref<8x32x8xf32, #tpu.memory_space<vmem>>, %arg6: memref<8x1x8xf32, #tpu.memory_space<vmem>>, %arg7: memref<8x8x32xf32, #tpu.memory_space<vmem>>, %arg8: memref<1x32xf32, #tpu.memory_space<vmem>>, %arg9: memref<32x64xf32, #tpu.memory_space<vmem>>, %arg10: memref<1x64xf32, #tpu.memory_space<vmem>>, %arg11: memref<64x32xf32, #tpu.memory_space<vmem>>, %arg12: memref<1x32xf32, #tpu.memory_space<vmem>>, %arg13: memref<1x32xf32, #tpu.memory_space<vmem>>, %arg14: memref<1x32xf32, #tpu.memory_space<vmem>>, %arg15: memref<1x32xf32, #tpu.memory_space<vmem>>, %arg16: memref<1x32xf32, #tpu.memory_space<vmem>>, %arg17: memref<2x8x32xf32, #tpu.memory_space<vmem>>) attributes {dimension_semantics = [], scalar_prefetch = 0 : i64, scratch_operands = 0 : i64, tpu.core_type = #tpu.core_type<tc>} {
    %c0 = arith.constant 0 : index
    %c0_0 = arith.constant 0 : index
    %c0_1 = arith.constant 0 : index
    %0 = vector.load %arg0[%c0, %c0_0, %c0_1] : memref<2x8x32xf32, #tpu.memory_space<vmem>>, vector<2x8x32xf32>
    %1 = vector.shape_cast %0 : vector<2x8x32xf32> to vector<16x32xf32>
    %2 = arith.truncf %0 : vector<2x8x32xf32> to vector<2x8x32xbf16>
    %3 = tpu.concatenate %2, %2, %2, %2 in 0 : vector<2x8x32xbf16>, vector<2x8x32xbf16>, vector<2x8x32xbf16>, vector<2x8x32xbf16> -> vector<8x8x32xbf16>
    %c0_2 = arith.constant 0 : index
    %c0_3 = arith.constant 0 : index
    %c0_4 = arith.constant 0 : index
    %4 = vector.load %arg1[%c0_2, %c0_3, %c0_4] : memref<8x32x8xf32, #tpu.memory_space<vmem>>, vector<8x32x8xf32>
    %5 = arith.truncf %4 : vector<8x32x8xf32> to vector<8x32x8xbf16>
    %c0_5 = arith.constant 0 : index
    %c0_6 = arith.constant 0 : index
    %c0_7 = arith.constant 0 : index
    %6 = vector.load %arg3[%c0_5, %c0_6, %c0_7] : memref<8x32x8xf32, #tpu.memory_space<vmem>>, vector<8x32x8xf32>
    %7 = arith.truncf %6 : vector<8x32x8xf32> to vector<8x32x8xbf16>
    %c0_8 = arith.constant 0 : index
    %c0_9 = arith.constant 0 : index
    %c0_10 = arith.constant 0 : index
    %8 = vector.load %arg5[%c0_8, %c0_9, %c0_10] : memref<8x32x8xf32, #tpu.memory_space<vmem>>, vector<8x32x8xf32>
    %9 = arith.truncf %8 : vector<8x32x8xf32> to vector<8x32x8xbf16>
    %c0_11 = arith.constant 0 : index
    %c0_12 = arith.constant 0 : index
    %c0_13 = arith.constant 0 : index
    %10 = vector.load %arg7[%c0_11, %c0_12, %c0_13] : memref<8x8x32xf32, #tpu.memory_space<vmem>>, vector<8x8x32xf32>
    %11 = arith.truncf %10 : vector<8x8x32xf32> to vector<8x8x32xbf16>
    "tpu.trace_start"() <{level = 10 : i32, message = "bsd,bde->bse"}> : () -> ()
    %cst = arith.constant dense<0.000000e+00> : vector<8x8x8xf32>
    %12 = tpu.matmul %3, %5, %cst {dimension_numbers = #tpu.dot_dimension_numbers<[2], [1], [1], [2], [0, 0, 0, 1, 1, 2], [0], [0]>} : vector<8x8x32xbf16>, vector<8x32x8xbf16>, vector<8x8x8xf32> -> vector<8x8x8xf32>
    "tpu.trace_stop"() : () -> ()
    %c0_14 = arith.constant 0 : index
    %c0_15 = arith.constant 0 : index
    %c0_16 = arith.constant 0 : index
    %13 = vector.load %arg2[%c0_14, %c0_15, %c0_16] : memref<8x1x8xf32, #tpu.memory_space<vmem>>, vector<8x1x8xf32>
    %14 = vector.broadcast %13 : vector<8x1x8xf32> to vector<8x8x8xf32>
    %15 = arith.addf %12, %14 : vector<8x8x8xf32>
    "tpu.trace_start"() <{level = 10 : i32, message = "bsd,bde->bse"}> : () -> ()
    %cst_17 = arith.constant dense<0.000000e+00> : vector<8x8x8xf32>
    %16 = tpu.matmul %3, %7, %cst_17 {dimension_numbers = #tpu.dot_dimension_numbers<[2], [1], [1], [2], [0, 0, 0, 1, 1, 2], [0], [0]>} : vector<8x8x32xbf16>, vector<8x32x8xbf16>, vector<8x8x8xf32> -> vector<8x8x8xf32>
    "tpu.trace_stop"() : () -> ()
    %c0_18 = arith.constant 0 : index
    %c0_19 = arith.constant 0 : index
    %c0_20 = arith.constant 0 : index
    %17 = vector.load %arg4[%c0_18, %c0_19, %c0_20] : memref<8x1x8xf32, #tpu.memory_space<vmem>>, vector<8x1x8xf32>
    %18 = vector.broadcast %17 : vector<8x1x8xf32> to vector<8x8x8xf32>
    %19 = arith.addf %16, %18 : vector<8x8x8xf32>
    "tpu.trace_start"() <{level = 10 : i32, message = "bsd,bde->bse"}> : () -> ()
    %cst_21 = arith.constant dense<0.000000e+00> : vector<8x8x8xf32>
    %20 = tpu.matmul %3, %9, %cst_21 {dimension_numbers = #tpu.dot_dimension_numbers<[2], [1], [1], [2], [0, 0, 0, 1, 1, 2], [0], [0]>} : vector<8x8x32xbf16>, vector<8x32x8xbf16>, vector<8x8x8xf32> -> vector<8x8x8xf32>
    "tpu.trace_stop"() : () -> ()
    %c0_22 = arith.constant 0 : index
    %c0_23 = arith.constant 0 : index
    %c0_24 = arith.constant 0 : index
    %21 = vector.load %arg6[%c0_22, %c0_23, %c0_24] : memref<8x1x8xf32, #tpu.memory_space<vmem>>, vector<8x1x8xf32>
    %22 = vector.broadcast %21 : vector<8x1x8xf32> to vector<8x8x8xf32>
    %23 = arith.addf %20, %22 : vector<8x8x8xf32>
    %cst_25 = arith.constant 0.353553385 : f32
    %24 = vector.broadcast %cst_25 : f32 to vector<8x8x8xf32>
    %25 = arith.mulf %15, %24 : vector<8x8x8xf32>
    %26 = arith.truncf %25 : vector<8x8x8xf32> to vector<8x8x8xbf16>
    %27 = arith.truncf %19 : vector<8x8x8xf32> to vector<8x8x8xbf16>
    "tpu.trace_start"() <{level = 10 : i32, message = "bqd,bkd->bqk"}> : () -> ()
    %cst_26 = arith.constant dense<0.000000e+00> : vector<8x8x8xf32>
    %28 = tpu.matmul %26, %27, %cst_26 {dimension_numbers = #tpu.dot_dimension_numbers<[2], [2], [1], [1], [0, 0, 0, 1, 1, 1], [0], [0]>} : vector<8x8x8xbf16>, vector<8x8x8xbf16>, vector<8x8x8xf32> -> vector<8x8x8xf32>
    "tpu.trace_stop"() : () -> ()
    %cst_27 = arith.constant dense<0xFF800000> : vector<8x8xf32>
    %29 = vector.multi_reduction <maximumf>, %28, %cst_27 [2] : vector<8x8x8xf32> to vector<8x8xf32>
    %30 = vector.shape_cast %29 : vector<8x8xf32> to vector<8x8x1xf32>
    %31 = vector.broadcast %30 : vector<8x8x1xf32> to vector<8x8x8xf32>
    %32 = arith.subf %28, %31 : vector<8x8x8xf32>
    %33 = math.exp %32 : vector<8x8x8xf32>
    %cst_28 = arith.constant dense<0.000000e+00> : vector<8x8xf32>
    %34 = vector.multi_reduction <add>, %33, %cst_28 [2] : vector<8x8x8xf32> to vector<8x8xf32>
    %35 = vector.shape_cast %34 : vector<8x8xf32> to vector<8x8x1xf32>
    %36 = tpu.reciprocal %35 {approx = true} : vector<8x8x1xf32> -> vector<8x8x1xf32>
    %37 = vector.broadcast %36 : vector<8x8x1xf32> to vector<8x8x8xf32>
    %38 = arith.mulf %33, %37 : vector<8x8x8xf32>
    %39 = arith.truncf %38 : vector<8x8x8xf32> to vector<8x8x8xbf16>
    %40 = arith.truncf %23 : vector<8x8x8xf32> to vector<8x8x8xbf16>
    "tpu.trace_start"() <{level = 10 : i32, message = "bqk,bkd->bqd"}> : () -> ()
    %cst_29 = arith.constant dense<0.000000e+00> : vector<8x8x8xf32>
    %41 = tpu.matmul %39, %40, %cst_29 {dimension_numbers = #tpu.dot_dimension_numbers<[2], [1], [1], [2], [0, 0, 0, 1, 1, 2], [0], [0]>} : vector<8x8x8xbf16>, vector<8x8x8xbf16>, vector<8x8x8xf32> -> vector<8x8x8xf32>
    "tpu.trace_stop"() : () -> ()
    %42 = arith.truncf %41 : vector<8x8x8xf32> to vector<8x8x8xbf16>
    "tpu.trace_start"() <{level = 10 : i32, message = "bsd,bde->bse"}> : () -> ()
    %cst_30 = arith.constant dense<0.000000e+00> : vector<8x8x32xf32>
    %43 = tpu.matmul %42, %11, %cst_30 {dimension_numbers = #tpu.dot_dimension_numbers<[2], [1], [1], [2], [0, 0, 0, 1, 1, 2], [0], [0]>} : vector<8x8x8xbf16>, vector<8x8x32xbf16>, vector<8x8x32xf32> -> vector<8x8x32xf32>
    "tpu.trace_stop"() : () -> ()
    %44 = vector.shape_cast %43 : vector<8x8x32xf32> to vector<4x2x8x32xf32>
    %45 = vector.extract_strided_slice %44 {offsets = [0, 0, 0, 0], sizes = [1, 2, 8, 32], strides = [1, 1, 1, 1]} : vector<4x2x8x32xf32> to vector<1x2x8x32xf32>
    %46 = vector.shape_cast %45 : vector<1x2x8x32xf32> to vector<2x8x32xf32>
    %47 = vector.extract_strided_slice %44 {offsets = [1, 0, 0, 0], sizes = [1, 2, 8, 32], strides = [1, 1, 1, 1]} : vector<4x2x8x32xf32> to vector<1x2x8x32xf32>
    %48 = vector.shape_cast %47 : vector<1x2x8x32xf32> to vector<2x8x32xf32>
    %49 = arith.addf %46, %48 : vector<2x8x32xf32>
    %50 = vector.extract_strided_slice %44 {offsets = [2, 0, 0, 0], sizes = [1, 2, 8, 32], strides = [1, 1, 1, 1]} : vector<4x2x8x32xf32> to vector<1x2x8x32xf32>
    %51 = vector.shape_cast %50 : vector<1x2x8x32xf32> to vector<2x8x32xf32>
    %52 = arith.addf %49, %51 : vector<2x8x32xf32>
    %53 = vector.extract_strided_slice %44 {offsets = [3, 0, 0, 0], sizes = [1, 2, 8, 32], strides = [1, 1, 1, 1]} : vector<4x2x8x32xf32> to vector<1x2x8x32xf32>
    %54 = vector.shape_cast %53 : vector<1x2x8x32xf32> to vector<2x8x32xf32>
    %55 = arith.addf %52, %54 : vector<2x8x32xf32>
    %56 = vector.shape_cast %55 : vector<2x8x32xf32> to vector<16x32xf32>
    %c0_31 = arith.constant 0 : index
    %c0_32 = arith.constant 0 : index
    %57 = vector.load %arg8[%c0_31, %c0_32] : memref<1x32xf32, #tpu.memory_space<vmem>>, vector<1x32xf32>
    %58 = vector.broadcast %57 : vector<1x32xf32> to vector<16x32xf32>
    %59 = arith.addf %56, %58 : vector<16x32xf32>
    %60 = arith.addf %1, %59 : vector<16x32xf32>
    %cst_33 = arith.constant dense<0.000000e+00> : vector<32xf32>
    %61 = vector.multi_reduction <add>, %60, %cst_33 [0] : vector<16x32xf32> to vector<32xf32>
    %62 = vector.shape_cast %61 : vector<32xf32> to vector<1x32xf32>
    %cst_34 = arith.constant 1.600000e+01 : f32
    %63 = vector.broadcast %cst_34 : f32 to vector<1x32xf32>
    %64 = arith.divf %62, %63 : vector<1x32xf32>
    %65 = vector.broadcast %64 : vector<1x32xf32> to vector<16x32xf32>
    %66 = arith.subf %60, %65 : vector<16x32xf32>
    %67 = arith.mulf %66, %66 : vector<16x32xf32>
    %cst_35 = arith.constant dense<0.000000e+00> : vector<32xf32>
    %68 = vector.multi_reduction <add>, %67, %cst_35 [0] : vector<16x32xf32> to vector<32xf32>
    %69 = vector.shape_cast %68 : vector<32xf32> to vector<1x32xf32>
    %cst_36 = arith.constant 1.600000e+01 : f32
    %70 = vector.broadcast %cst_36 : f32 to vector<1x32xf32>
    %71 = arith.divf %69, %70 : vector<1x32xf32>
    %cst_37 = arith.constant 9.99999974E-6 : f32
    %72 = vector.broadcast %cst_37 : f32 to vector<1x32xf32>
    %73 = arith.addf %71, %72 : vector<1x32xf32>
    %74 = math.rsqrt %73 : vector<1x32xf32>
    %75 = vector.broadcast %74 : vector<1x32xf32> to vector<16x32xf32>
    %76 = arith.mulf %66, %75 : vector<16x32xf32>
    %c0_38 = arith.constant 0 : index
    %c0_39 = arith.constant 0 : index
    %77 = vector.load %arg13[%c0_38, %c0_39] : memref<1x32xf32, #tpu.memory_space<vmem>>, vector<1x32xf32>
    %78 = vector.broadcast %77 : vector<1x32xf32> to vector<16x32xf32>
    %79 = arith.mulf %76, %78 : vector<16x32xf32>
    %c0_40 = arith.constant 0 : index
    %c0_41 = arith.constant 0 : index
    %80 = vector.load %arg14[%c0_40, %c0_41] : memref<1x32xf32, #tpu.memory_space<vmem>>, vector<1x32xf32>
    %81 = vector.broadcast %80 : vector<1x32xf32> to vector<16x32xf32>
    %82 = arith.addf %79, %81 : vector<16x32xf32>
    %83 = arith.truncf %82 : vector<16x32xf32> to vector<16x32xbf16>
    %c0_42 = arith.constant 0 : index
    %c0_43 = arith.constant 0 : index
    %84 = vector.load %arg9[%c0_42, %c0_43] : memref<32x64xf32, #tpu.memory_space<vmem>>, vector<32x64xf32>
    %85 = arith.truncf %84 : vector<32x64xf32> to vector<32x64xbf16>
    %cst_44 = arith.constant dense<0.000000e+00> : vector<16x64xf32>
    %86 = tpu.matmul %83, %85, %cst_44 {dimension_numbers = #tpu.dot_dimension_numbers<[1], [0], [0], [1], [0, 0, 1, 1], [], []>} : vector<16x32xbf16>, vector<32x64xbf16>, vector<16x64xf32> -> vector<16x64xf32>
    %c0_45 = arith.constant 0 : index
    %c0_46 = arith.constant 0 : index
    %87 = vector.load %arg10[%c0_45, %c0_46] : memref<1x64xf32, #tpu.memory_space<vmem>>, vector<1x64xf32>
    %88 = vector.broadcast %87 : vector<1x64xf32> to vector<16x64xf32>
    %89 = arith.addf %86, %88 : vector<16x64xf32>
    %cst_47 = arith.constant 5.000000e-01 : f32
    %90 = vector.broadcast %cst_47 : f32 to vector<16x64xf32>
    %91 = arith.mulf %90, %89 : vector<16x64xf32>
    %92 = arith.mulf %89, %89 : vector<16x64xf32>
    %93 = arith.mulf %92, %89 : vector<16x64xf32>
    %cst_48 = arith.constant 4.471500e-02 : f32
    %94 = vector.broadcast %cst_48 : f32 to vector<16x64xf32>
    %95 = arith.mulf %94, %93 : vector<16x64xf32>
    %96 = arith.addf %89, %95 : vector<16x64xf32>
    %cst_49 = arith.constant 0.797884583 : f32
    %97 = vector.broadcast %cst_49 : f32 to vector<16x64xf32>
    %98 = arith.mulf %97, %96 : vector<16x64xf32>
    %99 = math.tanh %98 : vector<16x64xf32>
    %cst_50 = arith.constant 1.000000e+00 : f32
    %100 = vector.broadcast %cst_50 : f32 to vector<16x64xf32>
    %101 = arith.addf %100, %99 : vector<16x64xf32>
    %102 = arith.mulf %91, %101 : vector<16x64xf32>
    %103 = arith.truncf %102 : vector<16x64xf32> to vector<16x64xbf16>
    %c0_51 = arith.constant 0 : index
    %c0_52 = arith.constant 0 : index
    %104 = vector.load %arg11[%c0_51, %c0_52] : memref<64x32xf32, #tpu.memory_space<vmem>>, vector<64x32xf32>
    %105 = arith.truncf %104 : vector<64x32xf32> to vector<64x32xbf16>
    %cst_53 = arith.constant dense<0.000000e+00> : vector<16x32xf32>
    %106 = tpu.matmul %103, %105, %cst_53 {dimension_numbers = #tpu.dot_dimension_numbers<[1], [0], [0], [1], [0, 0, 1, 1], [], []>} : vector<16x64xbf16>, vector<64x32xbf16>, vector<16x32xf32> -> vector<16x32xf32>
    %c0_54 = arith.constant 0 : index
    %c0_55 = arith.constant 0 : index
    %107 = vector.load %arg12[%c0_54, %c0_55] : memref<1x32xf32, #tpu.memory_space<vmem>>, vector<1x32xf32>
    %108 = vector.broadcast %107 : vector<1x32xf32> to vector<16x32xf32>
    %109 = arith.addf %106, %108 : vector<16x32xf32>
    %110 = arith.addf %82, %109 : vector<16x32xf32>
    %cst_56 = arith.constant dense<0.000000e+00> : vector<32xf32>
    %111 = vector.multi_reduction <add>, %110, %cst_56 [0] : vector<16x32xf32> to vector<32xf32>
    %112 = vector.shape_cast %111 : vector<32xf32> to vector<1x32xf32>
    %cst_57 = arith.constant 1.600000e+01 : f32
    %113 = vector.broadcast %cst_57 : f32 to vector<1x32xf32>
    %114 = arith.divf %112, %113 : vector<1x32xf32>
    %115 = vector.broadcast %114 : vector<1x32xf32> to vector<16x32xf32>
    %116 = arith.subf %110, %115 : vector<16x32xf32>
    %117 = arith.mulf %116, %116 : vector<16x32xf32>
    %cst_58 = arith.constant dense<0.000000e+00> : vector<32xf32>
    %118 = vector.multi_reduction <add>, %117, %cst_58 [0] : vector<16x32xf32> to vector<32xf32>
    %119 = vector.shape_cast %118 : vector<32xf32> to vector<1x32xf32>
    %cst_59 = arith.constant 1.600000e+01 : f32
    %120 = vector.broadcast %cst_59 : f32 to vector<1x32xf32>
    %121 = arith.divf %119, %120 : vector<1x32xf32>
    %cst_60 = arith.constant 9.99999974E-6 : f32
    %122 = vector.broadcast %cst_60 : f32 to vector<1x32xf32>
    %123 = arith.addf %121, %122 : vector<1x32xf32>
    %124 = math.rsqrt %123 : vector<1x32xf32>
    %125 = vector.broadcast %124 : vector<1x32xf32> to vector<16x32xf32>
    %126 = arith.mulf %116, %125 : vector<16x32xf32>
    %c0_61 = arith.constant 0 : index
    %c0_62 = arith.constant 0 : index
    %127 = vector.load %arg15[%c0_61, %c0_62] : memref<1x32xf32, #tpu.memory_space<vmem>>, vector<1x32xf32>
    %128 = vector.broadcast %127 : vector<1x32xf32> to vector<16x32xf32>
    %129 = arith.mulf %126, %128 : vector<16x32xf32>
    %c0_63 = arith.constant 0 : index
    %c0_64 = arith.constant 0 : index
    %130 = vector.load %arg16[%c0_63, %c0_64] : memref<1x32xf32, #tpu.memory_space<vmem>>, vector<1x32xf32>
    %131 = vector.broadcast %130 : vector<1x32xf32> to vector<16x32xf32>
    %132 = arith.addf %129, %131 : vector<16x32xf32>
    %133 = vector.shape_cast %132 : vector<16x32xf32> to vector<2x8x32xf32>
    %c0_65 = arith.constant 0 : index
    %c0_66 = arith.constant 0 : index
    %c0_67 = arith.constant 0 : index
    %134 = vector.load %arg17[%c0_65, %c0_66, %c0_67] : memref<2x8x32xf32, #tpu.memory_space<vmem>>, vector<2x8x32xf32>
    tpu.vector_store %arg17[%c0_65, %c0_66, %c0_67], %133 {strides = array<i32>} : memref<2x8x32xf32, #tpu.memory_space<vmem>>, vector<2x8x32xf32>,
    return
  }
}

</mosaic_0001>

<bundles_post_ra>
// kernel: tpu_custom_call.1
= control target key start
LH: loop header
LB: loop body
LE: loop exit
PB: predicated region body
PF: predicated region fallthrough
CT: control target
= control target key end

     0   :  { %s4413_s0 = inlined_call_operand.vmem [shape: f32[2,8,32], index: 0, kind: input, shape index: {}]   ;;  %s4414_s1 = inlined_call_operand.vmem [shape: f32[8,32,8], index: 1, kind: input, shape index: {}]   ;;  %s4415_s2 = inlined_call_operand.vmem [shape: f32[8,1,8], index: 2, kind: input, shape index: {}]   ;;  %s4416_s3 = inlined_call_operand.vmem [shape: f32[8,32,8], index: 3, kind: input, shape index: {}]   ;;  %s4417_s4 = inlined_call_operand.vmem [shape: f32[8,1,8], index: 4, kind: input, shape index: {}]   ;;  %s4418_s5 = inlined_call_operand.vmem [shape: f32[8,32,8], index: 5, kind: input, shape index: {}]   ;;  %s4419_s6 = inlined_call_operand.vmem [shape: f32[8,1,8], index: 6, kind: input, shape index: {}]   ;;  %s4420_s7 = inlined_call_operand.vmem [shape: f32[8,8,32], index: 7, kind: input, shape index: {}]   ;;  %s4421_s8 = inlined_call_operand.vmem [shape: f32[1,32], index: 8, kind: input, shape index: {}]   ;;  %s4422_s9 = inlined_call_operand.vmem [shape: f32[32,64], index: 9, kind: input, shape index: {}]   ;;  %s4423_s10 = inlined_call_operand.vmem [shape: f32[1,64], index: 10, kind: input, shape index: {}]   ;;  %s4424_s11 = inlined_call_operand.vmem [shape: f32[64,32], index: 11, kind: input, shape index: {}]   ;;  %s4425_s12 = inlined_call_operand.vmem [shape: f32[1,32], index: 12, kind: input, shape index: {}]   ;;  %s4426_s13 = inlined_call_operand.vmem [shape: f32[1,32], index: 13, kind: input, shape index: {}]   ;;  %s4427_s14 = inlined_call_operand.vmem [shape: f32[1,32], index: 14, kind: input, shape index: {}]   ;;  %s4428_s15 = inlined_call_operand.vmem [shape: f32[1,32], index: 15, kind: input, shape index: {}]   ;;  %s4429_s16 = inlined_call_operand.vmem [shape: f32[1,32], index: 16, kind: input, shape index: {}]   ;;  %s4430_s17 = inlined_call_operand.hbm [shape: f32[2,8,32], index: 17, kind: output, shape index: {}]  }
   0x1   :  { %4433 = sst [smem:[#allocation5_spill]] %s4413_s0 }
   0x2   :  { %4434 = sst [smem:[#allocation6_spill]] %s4414_s1 }
   0x3   :  { %s4435_s26 = sld [smem:[#allocation6_spill]]  ;;  %v3504_v3 = vmov 0.0   ;;  %vm3505_vm0 = vmmov 0   ;;  %vm278_vm1 = vcmask 261120  }
   0x4   :  { %3079 = vmatprep.subr.bf16.mxu0 %v3504_v3  ;;  %3087 = vmatprep.subr.bf16.mxu1 %v3504_v3  ;;  %s4436_s29 = sld [smem:[#allocation5_spill]] }
   0x5   :  { %3083 = vmatprep.mubr.msk.bf16.mxu0 %vm3505_vm0, %v3504_v3  ;;  %3091 = vmatprep.mubr.msk.bf16.mxu1 %vm3505_vm0, %v3504_v3 }
   0x9   :  { %v64_v0 = vld [vmem:[%s4435_s26 + $0x10] sm:$0xff]  ;;  %v65_v1 = vld [vmem:[%s4435_s26 + $0x18] sm:$0xff]  ;;  %v62_v6 = vld [vmem:[%s4435_s26] sm:$0xff] }
   0xa   :  { %v68_v2 = vld [vmem:[%s4435_s26 + $0x30] sm:$0xff]  ;;  %v95_v4 = vpack.c.bf16 %v65_v1, %v64_v0  ;;  %v69_v5 = vld [vmem:[%s4435_s26 + $0x38] sm:$0xff]  ;;  %v63_v7 = vld [vmem:[%s4435_s26 + $0x8] sm:$0xff] }
   0xb   :  { %v97_v8 = vpack.c.bf16 %v69_v5, %v68_v2  ;;  %v66_v9 = vld [vmem:[%s4435_s26 + $0x20] sm:$0xff]  ;;  %v67_v10 = vld [vmem:[%s4435_s26 + $0x28] sm:$0xff]  ;;  %v94_v11 = vpack.c.bf16 %v63_v7, %v62_v6  ;;  %v72_v15 = vld [vmem:[%s4435_s26 + $0x50] sm:$0xff] }
   0xc   :  { %3080 = vmatpush3.bf16.msra.mxu0 %v95_v4  ;;  %v58_v12 = vld [vmem:[%s4436_s29] sm:$0xff]  ;;  %v96_v13 = vpack.c.bf16 %v67_v10, %v66_v9  ;;  %v59_v14 = vld [vmem:[%s4436_s29 + $0x8] sm:$0xff]  ;;  %v73_v16 = vld [vmem:[%s4435_s26 + $0x58] sm:$0xff] }
   0xd   :  { %3088 = vmatpush3.bf16.msra.mxu1 %v97_v8  ;;  %3081 = vmatprep.subr.bf16.mxu0 %v3504_v3  ;;  %v76_v17 = vld [vmem:[%s4435_s26 + $0x70] sm:$0xff]  ;;  %v77_v18 = vld [vmem:[%s4435_s26 + $0x78] sm:$0xff]  ;;  %v3649_v19 = vpack.c.bf16 %v58_v12, %v58_v12  ;;  %v3651_v20 = vpack.c.bf16 %v59_v14, %v59_v14  ;;  %v99_v21 = vpack.c.bf16 %v73_v16, %v72_v15  ;;  %v70_v23 = vld [vmem:[%s4435_s26 + $0x40] sm:$0xff] }
   0xe   :  { %3089 = vmatprep.subr.bf16.mxu1 %v3504_v3  ;;  %v101_v22 = vpack.c.bf16 %v77_v18, %v76_v17  ;;  %v71_v24 = vld [vmem:[%s4435_s26 + $0x48] sm:$0xff]  ;;  %v74_v25 = vld [vmem:[%s4435_s26 + $0x60] sm:$0xff]  ;;  %v80_v29 = vld [vmem:[%s4435_s26 + $0x90] sm:$0xff] }
   0xf   :  { %v75_v26 = vld [vmem:[%s4435_s26 + $0x68] sm:$0xff]  ;;  %v98_v27 = vpack.c.bf16 %v71_v24, %v70_v23  ;;  %v81_v30 = vld [vmem:[%s4435_s26 + $0x98] sm:$0xff]  ;;  %v84_v31 = vld [vmem:[%s4435_s26 + $0xb0] sm:$0xff] }
  0x10   :  { %3082 = vmatpush3.bf16.msra.mxu0 %v94_v11  ;;  %v100_v28 = vpack.c.bf16 %v75_v26, %v74_v25  ;;  %v85_v32 = vld [vmem:[%s4435_s26 + $0xb8] sm:$0xff]  ;;  %v103_v33 = vpack.c.bf16 %v81_v30, %v80_v29  ;;  %v78_v35 = vld [vmem:[%s4435_s26 + $0x80] sm:$0xff]  ;;  %v79_v36 = vld [vmem:[%s4435_s26 + $0x88] sm:$0xff] }
  0x11   :  { %3090 = vmatpush3.bf16.msra.mxu1 %v96_v13  ;;  %3095 = vmatprep.subr.bf16.mxu0 %v3504_v3  ;;  %v105_v34 = vpack.c.bf16 %v85_v32, %v84_v31  ;;  %v82_v37 = vld [vmem:[%s4435_s26 + $0xa0] sm:$0xff]  ;;  %v83_v38 = vld [vmem:[%s4435_s26 + $0xa8] sm:$0xff]  ;;  %v102_v39 = vpack.c.bf16 %v79_v36, %v78_v35  ;;  %v88_v41 = vld [vmem:[%s4435_s26 + $0xd0] sm:$0xff] }
  0x12   :  { %3103 = vmatprep.subr.bf16.mxu1 %v3504_v3  ;;  %v104_v40 = vpack.c.bf16 %v83_v38, %v82_v37  ;;  %v89_v42 = vld [vmem:[%s4435_s26 + $0xd8] sm:$0xff]  ;;  %v92_v43 = vld [vmem:[%s4435_s26 + $0xf0] sm:$0xff] }
  0x13   :  { %3084 = vmatmul.mubr.msk.bf16.vlgmr.msra.gmra.mxu0 %vm278_vm1, %v3649_v19  ;;  %v93_v44 = vld [vmem:[%s4435_s26 + $0xf8] sm:$0xff] }
  0x14   :  { %3092 = vmatmul.mubr.msk.bf16.vlgmr.msra.gmra.mxu1 %vm278_vm1, %v3651_v20  ;;  %3096 = vmatpush3.bf16.msra.mxu0 %v99_v21 }
  0x15   :  { %3104 = vmatpush3.bf16.msra.mxu1 %v101_v22  ;;  %3097 = vmatprep.subr.bf16.mxu0 %v3504_v3 }
  0x16   :  { %3105 = vmatprep.subr.bf16.mxu1 %v3504_v3  ;;  %3099 = vmatprep.mubr.msk.bf16.mxu0 %vm3505_vm0, %v3504_v3 }
  0x17   :  { %3107 = vmatprep.mubr.msk.bf16.mxu1 %vm3505_vm0, %v3504_v3 }
  0x18   :  { %3098 = vmatpush3.bf16.msra.mxu0 %v98_v27 }
  0x19   :  { %3106 = vmatpush3.bf16.msra.mxu1 %v100_v28  ;;  %3111 = vmatprep.subr.bf16.mxu0 %v3504_v3 }
  0x1a   :  { %3119 = vmatprep.subr.bf16.mxu1 %v3504_v3 }
  0x1b   :  { %3100 = vmatmul.mubr.msk.bf16.vlgmr.msra.gmra.mxu0 %vm278_vm1, %v3649_v19 }
  0x1c   :  { %3108 = vmatmul.mubr.msk.bf16.vlgmr.msra.gmra.mxu1 %vm278_vm1, %v3651_v20  ;;  %3112 = vmatpush3.bf16.msra.mxu0 %v103_v33 }
  0x1d   :  { %3120 = vmatpush3.bf16.msra.mxu1 %v105_v34  ;;  %3113 = vmatprep.subr.bf16.mxu0 %v3504_v3 }
  0x1e   :  { %3121 = vmatprep.subr.bf16.mxu1 %v3504_v3  ;;  %3115 = vmatprep.mubr.msk.bf16.mxu0 %vm3505_vm0, %v3504_v3 }
  0x1f   :  { %3123 = vmatprep.mubr.msk.bf16.mxu1 %vm3505_vm0, %v3504_v3 }
  0x20   :  { %22 = vsyncpa [#allocation3], 0  ;;  %3114 = vmatpush3.bf16.msra.mxu0 %v102_v39  ;;  %v107_v45 = vpack.c.bf16 %v89_v42, %v88_v41  ;;  %v109_v46 = vpack.c.bf16 %v93_v44, %v92_v43  ;;  %v86_v47 = vld [vmem:[%s4435_s26 + $0xc0] sm:$0xff]  ;;  %v87_v48 = vld [vmem:[%s4435_s26 + $0xc8] sm:$0xff]  ;;  %vm1381_vm2 = vcmask 64512   ;;  %vm1857_vm3 = vcmask 1043456  }
  0x21   :  { %3122 = vmatpush3.bf16.msra.mxu1 %v104_v40  ;;  %3127 = vmatprep.subr.bf16.mxu0 %v3504_v3  ;;  %v90_v49 = vld [vmem:[%s4435_s26 + $0xe0] sm:$0xff]  ;;  %v91_v50 = vld [vmem:[%s4435_s26 + $0xe8] sm:$0xff]  ;;  %v106_v51 = vpack.c.bf16 %v87_v48, %v86_v47  ;;  %v112_v53 = vld [vmem:[%s4416_s3 + $0x10] sm:$0xff]  ;;  %vm2759_vm4 = vcmask 523264  }
  0x22   :  { %3135 = vmatprep.subr.bf16.mxu1 %v3504_v3  ;;  %v108_v52 = vpack.c.bf16 %v91_v50, %v90_v49  ;;  %v113_v54 = vld [vmem:[%s4416_s3 + $0x18] sm:$0xff]  ;;  %v116_v55 = vld [vmem:[%s4416_s3 + $0x30] sm:$0xff]  ;;  %v110_v59 = vld [vmem:[%s4416_s3] sm:$0xff] }
  0x23   :  { %3116 = vmatmul.mubr.msk.bf16.vlgmr.msra.gmra.mxu0 %vm278_vm1, %v3649_v19  ;;  %v117_v56 = vld [vmem:[%s4416_s3 + $0x38] sm:$0xff]  ;;  %v143_v57 = vpack.c.bf16 %v113_v54, %v112_v53  ;;  %v111_v60 = vld [vmem:[%s4416_s3 + $0x8] sm:$0xff]  ;;  %v114_v61 = vld [vmem:[%s4416_s3 + $0x20] sm:$0xff] }
  0x24   :  { %3124 = vmatmul.mubr.msk.bf16.vlgmr.msra.gmra.mxu1 %vm278_vm1, %v3651_v20  ;;  %3128 = vmatpush3.bf16.msra.mxu0 %v107_v45  ;;  %v145_v58 = vpack.c.bf16 %v117_v56, %v116_v55  ;;  %v115_v62 = vld [vmem:[%s4416_s3 + $0x28] sm:$0xff]  ;;  %v142_v63 = vpack.c.bf16 %v111_v60, %v110_v59  ;;  %v120_v1 = vld [vmem:[%s4416_s3 + $0x50] sm:$0xff]  ;;  %v121_v2 = vld [vmem:[%s4416_s3 + $0x58] sm:$0xff] }
  0x25   :  { %3136 = vmatpush3.bf16.msra.mxu1 %v109_v46  ;;  %3129 = vmatprep.subr.bf16.mxu0 %v3504_v3  ;;  %v144_v0 = vpack.c.bf16 %v115_v62, %v114_v61  ;;  %v124_v4 = vld [vmem:[%s4416_s3 + $0x70] sm:$0xff]  ;;  %v125_v5 = vld [vmem:[%s4416_s3 + $0x78] sm:$0xff]  ;;  %v147_v6 = vpack.c.bf16 %v121_v2, %v120_v1  ;;  %v118_v8 = vld [vmem:[%s4416_s3 + $0x40] sm:$0xff] }
  0x26   :  { %3137 = vmatprep.subr.bf16.mxu1 %v3504_v3  ;;  %3131 = vmatprep.mubr.msk.bf16.mxu0 %vm3505_vm0, %v3504_v3  ;;  %v149_v7 = vpack.c.bf16 %v125_v5, %v124_v4  ;;  %v119_v9 = vld [vmem:[%s4416_s3 + $0x48] sm:$0xff]  ;;  %v122_v10 = vld [vmem:[%s4416_s3 + $0x60] sm:$0xff]  ;;  %v128_v14 = vld [vmem:[%s4416_s3 + $0x90] sm:$0xff] }
  0x27   :  { %3139 = vmatprep.mubr.msk.bf16.mxu1 %vm3505_vm0, %v3504_v3  ;;  %v123_v11 = vld [vmem:[%s4416_s3 + $0x68] sm:$0xff]  ;;  %v146_v12 = vpack.c.bf16 %v119_v9, %v118_v8  ;;  %v129_v15 = vld [vmem:[%s4416_s3 + $0x98] sm:$0xff]  ;;  %v132_v16 = vld [vmem:[%s4416_s3 + $0xb0] sm:$0xff] }
  0x28   :  { %3130 = vmatpush3.bf16.msra.mxu0 %v106_v51  ;;  %v148_v13 = vpack.c.bf16 %v123_v11, %v122_v10  ;;  %v133_v17 = vld [vmem:[%s4416_s3 + $0xb8] sm:$0xff]  ;;  %v151_v18 = vpack.c.bf16 %v129_v15, %v128_v14  ;;  %v126_v22 = vld [vmem:[%s4416_s3 + $0x80] sm:$0xff]  ;;  %v127_v23 = vld [vmem:[%s4416_s3 + $0x88] sm:$0xff] }
  0x29   :  { %3138 = vmatpush3.bf16.msra.mxu1 %v108_v52  ;;  %3143 = vmatprep.subr.bf16.mxu0 %v3504_v3  ;;  %v153_v21 = vpack.c.bf16 %v133_v17, %v132_v16  ;;  %v130_v24 = vld [vmem:[%s4416_s3 + $0xa0] sm:$0xff]  ;;  %v131_v25 = vld [vmem:[%s4416_s3 + $0xa8] sm:$0xff]  ;;  %v150_v26 = vpack.c.bf16 %v127_v23, %v126_v22  ;;  %v136_v28 = vld [vmem:[%s4416_s3 + $0xd0] sm:$0xff] }
  0x2a   :  { %3151 = vmatprep.subr.bf16.mxu1 %v3504_v3  ;;  %v152_v27 = vpack.c.bf16 %v131_v25, %v130_v24  ;;  %v137_v29 = vld [vmem:[%s4416_s3 + $0xd8] sm:$0xff]  ;;  %v140_v30 = vld [vmem:[%s4416_s3 + $0xf0] sm:$0xff]  ;;  %v134_v34 = vld [vmem:[%s4416_s3 + $0xc0] sm:$0xff] }
  0x2b   :  { %3132 = vmatmul.mubr.msk.bf16.vlgmr.msra.gmra.mxu0 %vm278_vm1, %v3649_v19  ;;  %v141_v31 = vld [vmem:[%s4416_s3 + $0xf8] sm:$0xff]  ;;  %v155_v32 = vpack.c.bf16 %v137_v29, %v136_v28  ;;  %v135_v35 = vld [vmem:[%s4416_s3 + $0xc8] sm:$0xff]  ;;  %v138_v36 = vld [vmem:[%s4416_s3 + $0xe0] sm:$0xff] }
  0x2c   :  { %3140 = vmatmul.mubr.msk.bf16.vlgmr.msra.gmra.mxu1 %vm278_vm1, %v3651_v20  ;;  %3144 = vmatpush3.bf16.msra.mxu0 %v143_v57  ;;  %v157_v33 = vpack.c.bf16 %v141_v31, %v140_v30  ;;  %v139_v37 = vld [vmem:[%s4416_s3 + $0xe8] sm:$0xff]  ;;  %v154_v38 = vpack.c.bf16 %v135_v35, %v134_v34  ;;  %v160_v40 = vld [vmem:[%s4418_s5 + $0x10] sm:$0xff]  ;;  %v161_v41 = vld [vmem:[%s4418_s5 + $0x18] sm:$0xff] }
  0x2d   :  { %3152 = vmatpush3.bf16.msra.mxu1 %v145_v58  ;;  %3145 = vmatprep.subr.bf16.mxu0 %v3504_v3  ;;  %v156_v39 = vpack.c.bf16 %v139_v37, %v138_v36  ;;  %v191_v42 = vpack.c.bf16 %v161_v41, %v160_v40  ;;  %v158_v43 = vld [vmem:[%s4418_s5] sm:$0xff]  ;;  %v159_v44 = vld [vmem:[%s4418_s5 + $0x8] sm:$0xff]  ;;  %v164_v45 = vld [vmem:[%s4418_s5 + $0x30] sm:$0xff] }
  0x2e   :  { %3153 = vmatprep.subr.bf16.mxu1 %v3504_v3  ;;  %3147 = vmatprep.mubr.msk.bf16.mxu0 %vm3505_vm0, %v3504_v3  ;;  %v190_v46 = vpack.c.bf16 %v159_v44, %v158_v43  ;;  %v165_v47 = vld [vmem:[%s4418_s5 + $0x38] sm:$0xff]  ;;  %v162_v49 = vld [vmem:[%s4418_s5 + $0x20] sm:$0xff]  ;;  %v163_v50 = vld [vmem:[%s4418_s5 + $0x28] sm:$0xff] }
  0x2f   :  { %3155 = vmatprep.mubr.msk.bf16.mxu1 %vm3505_vm0, %v3504_v3  ;;  %v193_v48 = vpack.c.bf16 %v165_v47, %v164_v45  ;;  %v168_v51 = vld [vmem:[%s4418_s5 + $0x50] sm:$0xff]  ;;  %v192_v52 = vpack.c.bf16 %v163_v50, %v162_v49  ;;  %v169_v53 = vld [vmem:[%s4418_s5 + $0x58] sm:$0xff]  ;;  %v166_v55 = vld [vmem:[%s4418_s5 + $0x40] sm:$0xff] }
  0x30   :  { %3146 = vmatpush3.bf16.msra.mxu0 %v142_v63  ;;  %v195_v54 = vpack.c.bf16 %v169_v53, %v168_v51  ;;  %v167_v56 = vld [vmem:[%s4418_s5 + $0x48] sm:$0xff]  ;;  %v172_v57 = vld [vmem:[%s4418_s5 + $0x70] sm:$0xff]  ;;  %v173_v59 = vld [vmem:[%s4418_s5 + $0x78] sm:$0xff] }
  0x31   :  { %3154 = vmatpush3.bf16.msra.mxu1 %v144_v0  ;;  %3159 = vmatprep.subr.bf16.mxu0 %v3504_v3  ;;  %v194_v58 = vpack.c.bf16 %v167_v56, %v166_v55  ;;  %v197_v60 = vpack.c.bf16 %v173_v59, %v172_v57  ;;  %v170_v61 = vld [vmem:[%s4418_s5 + $0x60] sm:$0xff]  ;;  %v171_v62 = vld [vmem:[%s4418_s5 + $0x68] sm:$0xff]  ;;  %v176_v63 = vld [vmem:[%s4418_s5 + $0x90] sm:$0xff] }
  0x32   :  { %3167 = vmatprep.subr.bf16.mxu1 %v3504_v3  ;;  %v196_v0 = vpack.c.bf16 %v171_v62, %v170_v61  ;;  %v177_v1 = vld [vmem:[%s4418_s5 + $0x98] sm:$0xff]  ;;  %v174_v4 = vld [vmem:[%s4418_s5 + $0x80] sm:$0xff]  ;;  %v175_v5 = vld [vmem:[%s4418_s5 + $0x88] sm:$0xff] }
  0x33   :  { %3148 = vmatmul.mubr.msk.bf16.vlgmr.msra.gmra.mxu0 %vm278_vm1, %v3649_v19  ;;  %v199_v2 = vpack.c.bf16 %v177_v1, %v176_v63  ;;  %v181_v8 = vld [vmem:[%s4418_s5 + $0xb8] sm:$0xff]  ;;  %v178_v10 = vld [vmem:[%s4418_s5 + $0xa0] sm:$0xff]  ;;  %v179_v11 = vld [vmem:[%s4418_s5 + $0xa8] sm:$0xff] }
  0x34   :  { %3156 = vmatmul.mubr.msk.bf16.vlgmr.msra.gmra.mxu1 %vm278_vm1, %v3651_v20  ;;  %3160 = vmatpush3.bf16.msra.mxu0 %v147_v6  ;;  %v180_v6 = vld [vmem:[%s4418_s5 + $0xb0] sm:$0xff]  ;;  %v185_v14 = vld [vmem:[%s4418_s5 + $0xd8] sm:$0xff]  ;;  %v182_v16 = vld [vmem:[%s4418_s5 + $0xc0] sm:$0xff] }
  0x35   :  { %3168 = vmatpush3.bf16.msra.mxu1 %v149_v7  ;;  %3161 = vmatprep.subr.bf16.mxu0 %v3504_v3  ;;  %v198_v7 = vpack.c.bf16 %v175_v5, %v174_v4  ;;  %v201_v9 = vpack.c.bf16 %v181_v8, %v180_v6  ;;  %v183_v17 = vld [vmem:[%s4418_s5 + $0xc8] sm:$0xff]  ;;  %v189_v22 = vld [vmem:[%s4418_s5 + $0xf8] sm:$0xff]  ;;  %v186_v24 = vld [vmem:[%s4418_s5 + $0xe0] sm:$0xff] }
  0x36   :  { %3169 = vmatprep.subr.bf16.mxu1 %v3504_v3  ;;  %3163 = vmatprep.mubr.msk.bf16.mxu0 %vm3505_vm0, %v3504_v3  ;;  %v187_v25 = vld [vmem:[%s4418_s5 + $0xe8] sm:$0xff]  ;;  %v2886_v56 = vld [vmem:[%s4417_s4] ss:$0 sm:$0xff]  ;;  %v2871_v61 = vld [vmem:[%s4415_s2 + $0x1] ss:$0 sm:$0xff] }
  0x37   :  { %3171 = vmatprep.mubr.msk.bf16.mxu1 %vm3505_vm0, %v3504_v3  ;;  %v2870_v59 = vld [vmem:[%s4415_s2] ss:$0 sm:$0xff] }
  0x38   :  { %3162 = vmatpush3.bf16.msra.mxu0 %v146_v12  ;;  %v184_v12 = vld [vmem:[%s4418_s5 + $0xd0] sm:$0xff] }
  0x39   :  { %3170 = vmatpush3.bf16.msra.mxu1 %v148_v13  ;;  %3175 = vmatprep.subr.bf16.mxu0 %v3504_v3  ;;  %v200_v13 = vpack.c.bf16 %v179_v11, %v178_v10  ;;  %v203_v15 = vpack.c.bf16 %v185_v14, %v184_v12 }
  0x3a   :  { %3183 = vmatprep.subr.bf16.mxu1 %v3504_v3 }
  0x3b   :  { %3164 = vmatmul.mubr.msk.bf16.vlgmr.msra.gmra.mxu0 %vm278_vm1, %v3649_v19 }
  0x3c   :  { %3172 = vmatmul.mubr.msk.bf16.vlgmr.msra.gmra.mxu1 %vm278_vm1, %v3651_v20  ;;  %3176 = vmatpush3.bf16.msra.mxu0 %v151_v18  ;;  %v188_v18 = vld [vmem:[%s4418_s5 + $0xf0] sm:$0xff] }
  0x3d   :  { %3184 = vmatpush3.bf16.msra.mxu1 %v153_v21  ;;  %3177 = vmatprep.subr.bf16.mxu0 %v3504_v3  ;;  %v202_v21 = vpack.c.bf16 %v183_v17, %v182_v16  ;;  %v205_v23 = vpack.c.bf16 %v189_v22, %v188_v18  ;;  %v2889_v16 = vld [vmem:[%s4417_s4 + $0x3] ss:$0 sm:$0xff]  ;;  %v2872_v18 = vld [vmem:[%s4415_s2 + $0x2] ss:$0 sm:$0xff] }
  0x3e   :  { %3185 = vmatprep.subr.bf16.mxu1 %v3504_v3  ;;  %3179 = vmatprep.mubr.msk.bf16.mxu0 %vm3505_vm0, %v3504_v3  ;;  %v2873_v22 = vld [vmem:[%s4415_s2 + $0x3] ss:$0 sm:$0xff] }
  0x3f   :  { %3187 = vmatprep.mubr.msk.bf16.mxu1 %vm3505_vm0, %v3504_v3 }
  0x40   :  { %3178 = vmatpush3.bf16.msra.mxu0 %v150_v26  ;;  %v204_v26 = vpack.c.bf16 %v187_v25, %v186_v24 }
  0x41   :  { %3186 = vmatpush3.bf16.msra.mxu1 %v152_v27  ;;  %3191 = vmatprep.subr.bf16.mxu0 %v3504_v3 }
  0x42   :  { %3199 = vmatprep.subr.bf16.mxu1 %v3504_v3 }
  0x43   :  { %3180 = vmatmul.mubr.msk.bf16.vlgmr.msra.gmra.mxu0 %vm278_vm1, %v3649_v19 }
  0x44   :  { %3188 = vmatmul.mubr.msk.bf16.vlgmr.msra.gmra.mxu1 %vm278_vm1, %v3651_v20  ;;  %3192 = vmatpush3.bf16.msra.mxu0 %v155_v32 }
  0x45   :  { %3200 = vmatpush3.bf16.msra.mxu1 %v157_v33  ;;  %3193 = vmatprep.subr.bf16.mxu0 %v3504_v3 }
  0x46   :  { %3201 = vmatprep.subr.bf16.mxu1 %v3504_v3  ;;  %3195 = vmatprep.mubr.msk.bf16.mxu0 %vm3505_vm0, %v3504_v3 }
  0x47   :  { %3203 = vmatprep.mubr.msk.bf16.mxu1 %vm3505_vm0, %v3504_v3 }
  0x48   :  { %3194 = vmatpush3.bf16.msra.mxu0 %v154_v38 }
  0x49   :  { %3202 = vmatpush3.bf16.msra.mxu1 %v156_v39  ;;  %3207 = vmatprep.subr.bf16.mxu0 %v3504_v3 }
  0x4a   :  { %3215 = vmatprep.subr.bf16.mxu1 %v3504_v3 }
  0x4b   :  { %3196 = vmatmul.mubr.msk.bf16.vlgmr.msra.gmra.mxu0 %vm278_vm1, %v3649_v19 }
  0x4c   :  { %3204 = vmatmul.mubr.msk.bf16.vlgmr.msra.gmra.mxu1 %vm278_vm1, %v3651_v20  ;;  %3211 = vmatprep.mubr.msk.bf16.mxu0 %vm3505_vm0, %v3504_v3 }
  0x4d   :  { %3219 = vmatprep.mubr.msk.bf16.mxu1 %vm3505_vm0, %v3504_v3  ;;  %3208 = vmatpush3.bf16.msra.mxu0 %v191_v42 }
  0x4e   :  { %3209 = vmatprep.subr.bf16.mxu0 %v3504_v3  ;;  %3216 = vmatpush3.bf16.msra.mxu1 %v193_v48 }
  0x4f   :  { %3217 = vmatprep.subr.bf16.mxu1 %v3504_v3 }
  0x51   :  { %3210 = vmatpush3.bf16.msra.mxu0 %v190_v46 }
  0x52   :  { %3223 = vmatprep.subr.bf16.mxu0 %v3504_v3  ;;  %3218 = vmatpush3.bf16.msra.mxu1 %v192_v52 }
  0x53   :  { %3231 = vmatprep.subr.bf16.mxu1 %v3504_v3 }
  0x54   :  { %3212 = vmatmul.mubr.msk.bf16.vlgmr.msra.gmra.mxu0 %vm278_vm1, %v3649_v19 }
  0x55   :  { %3227 = vmatprep.mubr.msk.bf16.mxu0 %vm3505_vm0, %v3504_v3  ;;  %3224 = vmatpush3.bf16.msra.mxu0 %v195_v54 }
  0x56   :  { %3225 = vmatprep.subr.bf16.mxu0 %v3504_v3  ;;  %3220 = vmatmul.mubr.msk.bf16.vlgmr.msra.gmra.mxu1 %vm278_vm1, %v3651_v20 }
  0x57   :  { %3232 = vmatpush3.bf16.msra.mxu1 %v197_v60  ;;  %3235 = vmatprep.mubr.msk.bf16.mxu1 %vm3505_vm0, %v3504_v3 }
  0x58   :  { %3233 = vmatprep.subr.bf16.mxu1 %v3504_v3 }
  0x59   :  { %3226 = vmatpush3.bf16.msra.mxu0 %v194_v58  ;;  %v2887_v58 = vld [vmem:[%s4417_s4 + $0x1] ss:$0 sm:$0xff] }
  0x5a   :  { %3239 = vmatprep.subr.bf16.mxu0 %v3504_v3 }
  0x5b   :  { %3234 = vmatpush3.bf16.msra.mxu1 %v196_v0 }
  0x5c   :  { %3228 = vmatmul.mubr.msk.bf16.vlgmr.msra.gmra.mxu0 %vm278_vm1, %v3649_v19  ;;  %3247 = vmatprep.subr.bf16.mxu1 %v3504_v3 }
  0x5d   :  { %3240 = vmatpush3.bf16.msra.mxu0 %v199_v2  ;;  %3243 = vmatprep.mubr.msk.bf16.mxu0 %vm3505_vm0, %v3504_v3 }
  0x5e   :  { %3241 = vmatprep.subr.bf16.mxu0 %v3504_v3  ;;  %3236 = vmatmul.mubr.msk.bf16.vlgmr.msra.gmra.mxu1 %vm278_vm1, %v3651_v20 }
  0x5f   :  { %3248 = vmatpush3.bf16.msra.mxu1 %v201_v9  ;;  %3251 = vmatprep.mubr.msk.bf16.mxu1 %vm3505_vm0, %v3504_v3 }
  0x60   :  { %3249 = vmatprep.subr.bf16.mxu1 %v3504_v3 }
  0x61   :  { %3242 = vmatpush3.bf16.msra.mxu0 %v198_v7 }
  0x62   :  { %3255 = vmatprep.subr.bf16.mxu0 %v3504_v3 }
  0x63   :  { %3250 = vmatpush3.bf16.msra.mxu1 %v200_v13  ;;  %v2888_v13 = vld [vmem:[%s4417_s4 + $0x2] ss:$0 sm:$0xff] }
  0x64   :  { %3244 = vmatmul.mubr.msk.bf16.vlgmr.msra.gmra.mxu0 %vm278_vm1, %v3649_v19  ;;  %3263 = vmatprep.subr.bf16.mxu1 %v3504_v3 }
  0x65   :  { %3256 = vmatpush3.bf16.msra.mxu0 %v203_v15  ;;  %3259 = vmatprep.mubr.msk.bf16.mxu0 %vm3505_vm0, %v3504_v3 }
  0x66   :  { %3257 = vmatprep.subr.bf16.mxu0 %v3504_v3  ;;  %3252 = vmatmul.mubr.msk.bf16.vlgmr.msra.gmra.mxu1 %vm278_vm1, %v3651_v20 }
  0x67   :  { %3264 = vmatpush3.bf16.msra.mxu1 %v205_v23  ;;  %3267 = vmatprep.mubr.msk.bf16.mxu1 %vm3505_vm0, %v3504_v3 }
  0x68   :  { %3265 = vmatprep.subr.bf16.mxu1 %v3504_v3 }
  0x69   :  { %3258 = vmatpush3.bf16.msra.mxu0 %v202_v21 }
  0x6a   :  { %3271 = vmatprep.subr.bf16.mxu0 %v3504_v3 }
  0x6b   :  { %3266 = vmatpush3.bf16.msra.mxu1 %v204_v26 }
  0x6c   :  { %3260 = vmatmul.mubr.msk.bf16.vlgmr.msra.gmra.mxu0 %vm278_vm1, %v3649_v19  ;;  %3277 = vmatprep.subr.bf16.mxu1 %v3504_v3 }
  0x6d   :  { %3273 = vmatprep.mubr.msk.bf16.mxu0 %vm3505_vm0, %v3504_v3 }
  0x6e   :  { %3268 = vmatmul.mubr.msk.bf16.vlgmr.msra.gmra.mxu1 %vm278_vm1, %v3651_v20 }
  0x6f   :  { %3279 = vmatprep.mubr.msk.bf16.mxu1 %vm3505_vm0, %v3504_v3 }
  0xd3   :  { %v316_v27 = vpop.f32.mrf.mxu0 }
  0xd4   :  { %v359_v28 = vpop.f32.mrf.mxu1  ;;  %v317_v2 = vadd.f32 %v2870_v59, %v316_v27 }
  0xd5   :  { %v3085_v29 = vpop.f32.mrf.mxu0  ;;  %v360_v6 = vadd.f32 %v2871_v61, %v359_v28 }
  0xd6   :  { %v3093_v30 = vpop.f32.mrf.mxu1  ;;  %v1357_v14 = vmul.f32 0.35355338, %v317_v2 }
  0xd7   :  { %v319_v31 = vpop.f32.mrf.mxu0  ;;  %v1358_v17 = vmul.f32 0.35355338, %v360_v6 }
  0xd8   :  { %v362_v32 = vpop.f32.mrf.mxu1  ;;  %v1365_v27 = vpack.c.bf16 %v1357_v14, %v1357_v14 }
  0xd9   :  { %v3086_v33 = vpop.f32.mrf.mxu0  ;;  %v1366_v31 = vpack.c.bf16 %v1358_v17, %v1358_v17 }
  0xda   :  { %v3094_v19 = vpop.f32.mrf.mxu1 }
  0xdb   :  { %v399_v34 = vpop.f32.mrf.mxu0 }
  0xdc   :  { %v4047_v35 = vpop.f32.mrf.mxu1  ;;  %v400_v28 = vadd.f32 %v2872_v18, %v399_v34  ;;  %v2890_v34 = vld [vmem:[%s4417_s4 + $0x4] ss:$0 sm:$0xff] }
  0xdd   :  { %v3101_v36 = vpop.f32.mrf.mxu0  ;;  %v440_v32 = vadd.f32 %v2873_v22, %v4047_v35  ;;  %v2891_v35 = vld [vmem:[%s4417_s4 + $0x5] ss:$0 sm:$0xff] }
  0xde   :  { %v3109_v37 = vpop.f32.mrf.mxu1 }
  0xdf   :  { %v402_v38 = vpop.f32.mrf.mxu0 }
  0xe0   :  { %v442_v39 = vpop.f32.mrf.mxu1 }
  0xe1   :  { %v3102_v40 = vpop.f32.mrf.mxu0 }
  0xe2   :  { %v3110_v20 = vpop.f32.mrf.mxu1  ;;  %v1359_v40 = vmul.f32 0.35355338, %v400_v28 }
  0xe3   :  { %v4049_v41 = vpop.f32.mrf.mxu0 }
  0xe4   :  { %v4051_v42 = vpop.f32.mrf.mxu1 }
  0xe5   :  { %v3117_v43 = vpop.f32.mrf.mxu0 }
  0xe6   :  { %v3125_v44 = vpop.f32.mrf.mxu1  ;;  %v1360_v43 = vmul.f32 0.35355338, %v440_v32 }
  0xe7   :  { %v482_v45 = vpop.f32.mrf.mxu0  ;;  %v2874_v44 = vld [vmem:[%s4415_s2 + $0x4] ss:$0 sm:$0xff] }
  0xe8   :  { %v522_v46 = vpop.f32.mrf.mxu1 }
  0xe9   :  { %v3118_v47 = vpop.f32.mrf.mxu0  ;;  %v2875_v46 = vld [vmem:[%s4415_s2 + $0x5] ss:$0 sm:$0xff] }
  0xea   :  { %v3126_v48 = vpop.f32.mrf.mxu1 }
  0xeb   :  { %v4053_v49 = vpop.f32.mrf.mxu0 }
  0xec   :  { %v4055_v50 = vpop.f32.mrf.mxu1 }
  0xed   :  { %v3133_v51 = vpop.f32.mrf.mxu0 }
  0xee   :  { %v3141_v52 = vpop.f32.mrf.mxu1 }
  0xef   :  { %v562_v53 = vpop.f32.mrf.mxu0 }
  0xf0   :  { %v602_v54 = vpop.f32.mrf.mxu1  ;;  %v1367_v53 = vpack.c.bf16 %v1359_v40, %v1359_v40 }
  0xf1   :  { %v3134_v55 = vpop.f32.mrf.mxu0  ;;  %v480_v54 = vadd.f32 %v2874_v44, %v4049_v41  ;;  %v2892_v41 = vld [vmem:[%s4417_s4 + $0x6] ss:$0 sm:$0xff] }
  0xf2   :  { %v3142_v57 = vpop.f32.mrf.mxu1 }
  0xf3   :  { %v695_v60 = vpop.f32.mrf.mxu0  ;;  %v1368_v57 = vpack.c.bf16 %v1360_v43, %v1360_v43 }
  0xf4   :  { %v696_v62 = vadd.f32 %v2886_v56, %v695_v60  ;;  %v735_v63 = vpop.f32.mrf.mxu1 }
  0xf5   :  { %v736_v0 = vadd.f32 %v2887_v58, %v735_v63  ;;  %v3149_v1 = vpop.f32.mrf.mxu0  ;;  %v520_v58 = vadd.f32 %v2875_v46, %v4051_v42  ;;  %v2893_v42 = vld [vmem:[%s4417_s4 + $0x7] ss:$0 sm:$0xff] }
  0xf6   :  { %v1373_v4 = vpack.c.bf16 %v696_v62, %v696_v62  ;;  %v3157_v5 = vpop.f32.mrf.mxu1  ;;  %v1361_v1 = vmul.f32 0.35355338, %v480_v54 }
  0xf7   :  { %v1374_v7 = vpack.c.bf16 %v736_v0, %v736_v0  ;;  %v698_v8 = vpop.f32.mrf.mxu0  ;;  %v2876_v5 = vld [vmem:[%s4415_s2 + $0x6] ss:$0 sm:$0xff] }
  0xf8   :  { %v1386_v9 = vsel %vm1381_vm2, %v1373_v4, 0  ;;  %v738_v10 = vpop.f32.mrf.mxu1  ;;  %v1362_v4 = vmul.f32 0.35355338, %v520_v58 }
  0xf9   :  { %v1432_v11 = vsel %vm1381_vm2, %v1374_v7, 0  ;;  %v3150_v12 = vpop.f32.mrf.mxu0  ;;  %3272 = vmatpush3.bf16.xpose.msra.mxu0 %v1386_v9  ;;  %v2877_v7 = vld [vmem:[%s4415_s2 + $0x7] ss:$0 sm:$0xff] }
  0xfa   :  { %v3158_v15 = vpop.f32.mrf.mxu1  ;;  %3278 = vmatpush3.bf16.xpose.msra.mxu1 %v1432_v11  ;;  %3283 = vmatprep.subr.bf16.mxu0 %v3504_v3  ;;  %v1369_v12 = vpack.c.bf16 %v1361_v1, %v1361_v1  ;;  %v600_v17 = vadd.f32 %v2877_v7, %v4055_v50 }
  0xfb   :  { %v775_v21 = vpop.f32.mrf.mxu0  ;;  %3289 = vmatprep.subr.bf16.mxu1 %v3504_v3 }
  0xfc   :  { %v776_v23 = vadd.f32 %v2888_v13, %v775_v21  ;;  %v815_v24 = vpop.f32.mrf.mxu1  ;;  %v560_v13 = vadd.f32 %v2876_v5, %v4053_v49  ;;  %v1364_v50 = vmul.f32 0.35355338, %v600_v17 }
  0xfd   :  { %v816_v25 = vadd.f32 %v2889_v16, %v815_v24  ;;  %v3165_v26 = vpop.f32.mrf.mxu0  ;;  %v1370_v16 = vpack.c.bf16 %v1362_v4, %v1362_v4 }
  0xfe   :  { %v1375_v29 = vpack.c.bf16 %v776_v23, %v776_v23  ;;  %v3173_v30 = vpop.f32.mrf.mxu1  ;;  %v1363_v26 = vmul.f32 0.35355338, %v560_v13  ;;  %v1372_v28 = vpack.c.bf16 %v1364_v50, %v1364_v50 }
  0xff   :  { %v1376_v33 = vpack.c.bf16 %v816_v25, %v816_v25  ;;  %v778_v19 = vpop.f32.mrf.mxu0 }
 0x100   :  { %v1478_v36 = vsel %vm1381_vm2, %v1375_v29, 0  ;;  %v818_v37 = vpop.f32.mrf.mxu1  ;;  %3274 = vmatmul.mubr.msk.bf16.vlgmr.msra.gmra.mxu0 %vm1381_vm2, %v1365_v27  ;;  %v1371_v27 = vpack.c.bf16 %v1363_v26, %v1363_v26  ;;  %v2902_v29 = vld [vmem:[%s4419_s6] ss:$0 sm:$0xff]  ;;  %v2903_v19 = vld [vmem:[%s4419_s6 + $0x1] ss:$0 sm:$0xff] }
 0x101   :  { %v1524_v38 = vsel %vm1381_vm2, %v1376_v33, 0  ;;  %3280 = vmatmul.mubr.msk.bf16.vlgmr.msra.gmra.mxu1 %vm1381_vm2, %v1366_v31  ;;  %v3166_v39 = vpop.f32.mrf.mxu0  ;;  %3284 = vmatpush3.bf16.xpose.msra.mxu0 %v1478_v36 }
 0x102   :  { %v3174_v20 = vpop.f32.mrf.mxu1  ;;  %3290 = vmatpush3.bf16.xpose.msra.mxu1 %v1524_v38  ;;  %3285 = vmatprep.mubr.msk.bf16.mxu0 %vm3505_vm0, %v3504_v3 }
 0x103   :  { %v855_v45 = vpop.f32.mrf.mxu0  ;;  %3291 = vmatprep.mubr.msk.bf16.mxu1 %vm3505_vm0, %v3504_v3  ;;  %3295 = vmatprep.subr.bf16.mxu0 %v3504_v3 }
 0x104   :  { %v856_v47 = vadd.f32 %v2890_v34, %v855_v45  ;;  %v895_v48 = vpop.f32.mrf.mxu1  ;;  %3301 = vmatprep.subr.bf16.mxu1 %v3504_v3 }
 0x105   :  { %v896_v51 = vadd.f32 %v2891_v35, %v895_v48  ;;  %v3181_v52 = vpop.f32.mrf.mxu0 }
 0x106   :  { %v1377_v55 = vpack.c.bf16 %v856_v47, %v856_v47  ;;  %v3189_v56 = vpop.f32.mrf.mxu1 }
 0x107   :  { %v1378_v59 = vpack.c.bf16 %v896_v51, %v896_v51  ;;  %v858_v60 = vpop.f32.mrf.mxu0 }
 0x108   :  { %v1570_v61 = vsel %vm1381_vm2, %v1377_v55, 0  ;;  %v898_v62 = vpop.f32.mrf.mxu1  ;;  %3286 = vmatmul.mubr.msk.bf16.vlgmr.msra.gmra.mxu0 %vm1381_vm2, %v1367_v53 }
 0x109   :  { %v1616_v63 = vsel %vm1381_vm2, %v1378_v59, 0  ;;  %3292 = vmatmul.mubr.msk.bf16.vlgmr.msra.gmra.mxu1 %vm1381_vm2, %v1368_v57  ;;  %v3182_v0 = vpop.f32.mrf.mxu0  ;;  %3296 = vmatpush3.bf16.xpose.msra.mxu0 %v1570_v61 }
 0x10a   :  { %v3190_v2 = vpop.f32.mrf.mxu1  ;;  %3302 = vmatpush3.bf16.xpose.msra.mxu1 %v1616_v63  ;;  %3297 = vmatprep.mubr.msk.bf16.mxu0 %vm3505_vm0, %v3504_v3 }
 0x10b   :  { %v935_v6 = vpop.f32.mrf.mxu0  ;;  %3303 = vmatprep.mubr.msk.bf16.mxu1 %vm3505_vm0, %v3504_v3  ;;  %3307 = vmatprep.subr.bf16.mxu0 %v3504_v3 }
 0x10c   :  { %v936_v8 = vadd.f32 %v2892_v41, %v935_v6  ;;  %v975_v9 = vpop.f32.mrf.mxu1  ;;  %3313 = vmatprep.subr.bf16.mxu1 %v3504_v3 }
 0x10d   :  { %v976_v10 = vadd.f32 %v2893_v42, %v975_v9  ;;  %v3197_v11 = vpop.f32.mrf.mxu0 }
 0x10e   :  { %v1379_v14 = vpack.c.bf16 %v936_v8, %v936_v8  ;;  %v3205_v15 = vpop.f32.mrf.mxu1 }
 0x10f   :  { %v1380_v18 = vpack.c.bf16 %v976_v10, %v976_v10  ;;  %v938_v21 = vpop.f32.mrf.mxu0 }
 0x110   :  { %v1662_v22 = vsel %vm1381_vm2, %v1379_v14, 0  ;;  %v978_v23 = vpop.f32.mrf.mxu1  ;;  %3298 = vmatmul.mubr.msk.bf16.vlgmr.msra.gmra.mxu0 %vm1381_vm2, %v1369_v12 }
 0x111   :  { %v1708_v24 = vsel %vm1381_vm2, %v1380_v18, 0  ;;  %3304 = vmatmul.mubr.msk.bf16.vlgmr.msra.gmra.mxu1 %vm1381_vm2, %v1370_v16  ;;  %v3198_v25 = vpop.f32.mrf.mxu0  ;;  %3308 = vmatpush3.bf16.xpose.msra.mxu0 %v1662_v22 }
 0x112   :  { %v3206_v49 = vpop.f32.mrf.mxu1  ;;  %3314 = vmatpush3.bf16.xpose.msra.mxu1 %v1708_v24  ;;  %3309 = vmatprep.mubr.msk.bf16.mxu0 %vm3505_vm0, %v3504_v3 }
 0x113   :  { %3315 = vmatprep.mubr.msk.bf16.mxu1 %vm3505_vm0, %v3504_v3  ;;  %3319 = vmatprep.subr.bf16.mxu0 %v3504_v3 }
 0x114   :  { %3325 = vmatprep.subr.bf16.mxu1 %v3504_v3  ;;  %v1071_v30 = vpop.f32.mrf.mxu0 }
 0x115   :  { %v1072_v31 = vadd.f32 %v2902_v29, %v1071_v30 }
 0x116   :  { %v3213_v32 = vpop.f32.mrf.mxu0  ;;  %v1111_v38 = vpop.f32.mrf.mxu1 }
 0x117   :  { %v1846_v33 = vpack.c.bf16 %v1072_v31, %v1072_v31  ;;  %v1112_v39 = vadd.f32 %v2903_v19, %v1111_v38 }
 0x118   :  { %3310 = vmatmul.mubr.msk.bf16.vlgmr.msra.gmra.mxu0 %vm1381_vm2, %v1371_v27  ;;  %v1074_v36 = vpop.f32.mrf.mxu0  ;;  %v3221_v40 = vpop.f32.mrf.mxu1 }
 0x119   :  { %3316 = vmatmul.mubr.msk.bf16.vlgmr.msra.gmra.mxu1 %vm1381_vm2, %v1372_v28  ;;  %3321 = vmatprep.mubr.msk.bf16.mxu0 %vm3505_vm0, %v3504_v3  ;;  %v1859_v37 = vsel %vm1857_vm3, %v1846_v33, 0  ;;  %v1847_v20 = vpack.c.bf16 %v1112_v39, %v1112_v39 }
 0x11a   :  { %3327 = vmatprep.mubr.msk.bf16.mxu1 %vm3505_vm0, %v3504_v3  ;;  %v3214_v34 = vpop.f32.mrf.mxu0  ;;  %3320 = vmatpush3.bf16.msra.mxu0 %v1859_v37  ;;  %v1114_v35 = vpop.f32.mrf.mxu1 }
 0x11b   :  { %3331 = vmatprep.subr.bf16.mxu0 %v3504_v3  ;;  %v1905_v44 = vsel %vm1857_vm3, %v1847_v20, 0 }
 0x11c   :  { %v4158_v43 = vpop.f32.mrf.mxu0  ;;  %v3222_v45 = vpop.f32.mrf.mxu1  ;;  %3326 = vmatpush3.bf16.msra.mxu1 %v1905_v44 }
 0x11d   :  { %3337 = vmatprep.subr.bf16.mxu1 %v3504_v3 }
 0x11e   :  { %v3229_v46 = vpop.f32.mrf.mxu0  ;;  %v4162_v48 = vpop.f32.mrf.mxu1 }
 0x120   :  { %v1154_v47 = vpop.f32.mrf.mxu0  ;;  %v3237_v52 = vpop.f32.mrf.mxu1 }
 0x122   :  { %v3230_v51 = vpop.f32.mrf.mxu0  ;;  %v1194_v53 = vpop.f32.mrf.mxu1 }
 0x124   :  { %v4164_v54 = vpop.f32.mrf.mxu0  ;;  %v3238_v55 = vpop.f32.mrf.mxu1 }
 0x126   :  { %v3245_v56 = vpop.f32.mrf.mxu0  ;;  %v4166_v58 = vpop.f32.mrf.mxu1 }
 0x128   :  { %v1234_v57 = vpop.f32.mrf.mxu0  ;;  %v3253_v60 = vpop.f32.mrf.mxu1 }
 0x12a   :  { %v3246_v59 = vpop.f32.mrf.mxu0  ;;  %v1274_v61 = vpop.f32.mrf.mxu1 }
 0x12c   :  { %v4168_v62 = vpop.f32.mrf.mxu0  ;;  %v3254_v63 = vpop.f32.mrf.mxu1 }
 0x12e   :  { %v3261_v0 = vpop.f32.mrf.mxu0  ;;  %v4170_v1 = vpop.f32.mrf.mxu1 }
 0x130   :  { %v1314_v41 = vpop.f32.mrf.mxu0  ;;  %v3269_v42 = vpop.f32.mrf.mxu1 }
 0x132   :  { %v3262_v2 = vpop.f32.mrf.mxu0  ;;  %v1354_v4 = vpop.f32.mrf.mxu1 }
 0x134   :  { %v3270_v5 = vpop.f32.mrf.mxu1 }
 0x1c0   :  { %v1422_v6 = vpop.f32.mrf.mxu0 }
 0x1c1   :  { %v1468_v7 = vpop.f32.mrf.mxu1  ;;  %v1750_v8 = vsel %vm1381_vm2, %v1422_v6, -inf }
 0x1c2   :  { %1751 = vmax.xlane.f32.xlu0 %v1750_v8  ;;  %v3275_v9 = vpop.f32.mrf.mxu0  ;;  %v1753_v13 = vsel %vm1381_vm2, %v1468_v7, -inf }
 0x1c3   :  { %v3281_v10 = vpop.f32.mrf.mxu1 }
 0x1c4   :  { %v1425_v11 = vpop.f32.mrf.mxu0 }
 0x1c5   :  { %v1471_v12 = vpop.f32.mrf.mxu1 }
 0x1c6   :  { %1754 = vmax.xlane.f32.xlu0 %v1753_v13  ;;  %v3276_v14 = vpop.f32.mrf.mxu0 }
 0x1c7   :  { %v3282_v15 = vpop.f32.mrf.mxu1 }
 0x1c8   :  { %v1514_v16 = vpop.f32.mrf.mxu0 }
 0x1c9   :  { %v1560_v17 = vpop.f32.mrf.mxu1  ;;  %v1756_v18 = vsel %vm1381_vm2, %v1514_v16, -inf }
 0x1ca   :  { %1757 = vmax.xlane.f32.xlu1 %v1756_v18  ;;  %v3287_v21 = vpop.f32.mrf.mxu0  ;;  %v1759_v25 = vsel %vm1381_vm2, %v1560_v17, -inf }
 0x1cb   :  { %v3293_v22 = vpop.f32.mrf.mxu1 }
 0x1cc   :  { %v1517_v23 = vpop.f32.mrf.mxu0 }
 0x1cd   :  { %v1563_v24 = vpop.f32.mrf.mxu1 }
 0x1ce   :  { %1760 = vmax.xlane.f32.xlu1 %v1759_v25  ;;  %v3288_v26 = vpop.f32.mrf.mxu0 }
 0x1cf   :  { %v3294_v49 = vpop.f32.mrf.mxu1 }
 0x1d0   :  { %v1606_v50 = vpop.f32.mrf.mxu0 }
 0x1d1   :  { %v1652_v27 = vpop.f32.mrf.mxu1  ;;  %v1762_v28 = vsel %vm1381_vm2, %v1606_v50, -inf }
 0x1d2   :  { %v1765_v29 = vsel %vm1381_vm2, %v1652_v27, -inf  ;;  %1763 = vmax.xlane.f32.xlu0 %v1762_v28  ;;  %v3299_v30 = vpop.f32.mrf.mxu0 }
 0x1d3   :  { %v3305_v31 = vpop.f32.mrf.mxu1  ;;  %1766 = vmax.xlane.f32.xlu1 %v1765_v29 }
 0x1d4   :  { %v1609_v32 = vpop.f32.mrf.mxu0  ;;  %v2904_v31 = vld [vmem:[%s4419_s6 + $0x2] ss:$0 sm:$0xff] }
 0x1d5   :  { %v1655_v33 = vpop.f32.mrf.mxu1 }
 0x1d6   :  { %v3300_v19 = vpop.f32.mrf.mxu0  ;;  %v1152_v33 = vadd.f32 %v2904_v31, %v4158_v43 }
 0x1d7   :  { %v3306_v36 = vpop.f32.mrf.mxu1  ;;  %v2905_v19 = vld [vmem:[%s4419_s6 + $0x3] ss:$0 sm:$0xff] }
 0x1d8   :  { %v1698_v37 = vpop.f32.mrf.mxu0 }
 0x1d9   :  { %v1744_v38 = vpop.f32.mrf.mxu1  ;;  %v1768_v39 = vsel %vm1381_vm2, %v1698_v37, -inf }
 0x1da   :  { %v1771_v34 = vsel %vm1381_vm2, %v1744_v38, -inf  ;;  %1769 = vmax.xlane.f32.xlu0 %v1768_v39  ;;  %v3311_v40 = vpop.f32.mrf.mxu0  ;;  %v1192_v39 = vadd.f32 %v2905_v19, %v4162_v48  ;;  %v2907_v48 = vld [vmem:[%s4419_s6 + $0x5] ss:$0 sm:$0xff] }
 0x1db   :  { %v3317_v20 = vpop.f32.mrf.mxu1  ;;  %1772 = vmax.xlane.f32.xlu1 %v1771_v34  ;;  %v2906_v40 = vld [vmem:[%s4419_s6 + $0x4] ss:$0 sm:$0xff] }
 0x1dc   :  { %v1701_v35 = vpop.f32.mrf.mxu0 }
 0x1dd   :  { %v1747_v44 = vpop.f32.mrf.mxu1 }
 0x1de   :  { %v3312_v45 = vpop.f32.mrf.mxu0 }
 0x1df   :  { %v3318_v46 = vpop.f32.mrf.mxu1 }
 0x1e0   :  { %v1849_v46 = vpack.c.bf16 %v1192_v39, %v1192_v39 }
 0x24b   :  { %v1752_v47 = vpop.xlane.xlu0 %1751 }
 0x24c   :  { %v1774_v51 = vsub.f32 %v1422_v6, %v1752_v47  ;;  %v1232_v47 = vadd.f32 %v2906_v40, %v4164_v54  ;;  %v1272_v54 = vadd.f32 %v2907_v48, %v4166_v58 }
 0x24e   :  { %v1782_v52 = vmul.f32 1.442695, %v1774_v51 }
 0x24f   :  { %v1755_v53 = vpop.xlane.xlu0 %1754 }
 0x250   :  { %3440 = vpow2.f32 %v1782_v52  ;;  %v1775_v55 = vsub.f32 %v1468_v7, %v1755_v53 }
 0x252   :  { %v1784_v56 = vmul.f32 1.442695, %v1775_v55  ;;  %v1997_v55 = vsel %vm1857_vm3, %v1849_v46, 0 }
 0x253   :  { %v1758_v57 = vpop.xlane.xlu1 %1757 }
 0x254   :  { %3442 = vpow2.f32 %v1784_v56  ;;  %v1776_v59 = vsub.f32 %v1514_v16, %v1758_v57  ;;  %v1850_v56 = vpack.c.bf16 %v1232_v47, %v1232_v47 }
 0x256   :  { %v1786_v60 = vmul.f32 1.442695, %v1776_v59  ;;  %v2908_v59 = vld [vmem:[%s4419_s6 + $0x6] ss:$0 sm:$0xff]  ;;  %v2043_v58 = vsel %vm1857_vm3, %v1850_v56, 0 }
 0x257   :  { %v1761_v61 = vpop.xlane.xlu1 %1760 }
 0x258   :  { %3444 = vpow2.f32 %v1786_v60  ;;  %v1777_v63 = vsub.f32 %v1560_v17, %v1761_v61 }
 0x25a   :  { %v1788_v0 = vmul.f32 1.442695, %v1777_v63 }
 0x25b   :  { %v1764_v41 = vpop.xlane.xlu0 %1763 }
 0x25c   :  { %3446 = vpow2.f32 %v1788_v0  ;;  %v1767_v2 = vpop.xlane.xlu1 %1766  ;;  %v1778_v42 = vsub.f32 %v1606_v50, %v1764_v41  ;;  %v1851_v41 = vpack.c.bf16 %v1272_v54, %v1272_v54 }
 0x25d   :  { %v3441_v4 = vpop.eup %3440  ;;  %v1779_v5 = vsub.f32 %v1652_v27, %v1767_v2  ;;  %v1312_v2 = vadd.f32 %v2908_v59, %v4168_v62 }
 0x25e   :  { %v1790_v6 = vmul.f32 1.442695, %v1778_v42  ;;  %v1798_v8 = vsel %vm1381_vm2, %v3441_v4, 0.0 }
 0x25f   :  { %v1792_v9 = vmul.f32 1.442695, %v1779_v5  ;;  %1799 = vadd.xlane.f32.xlu0 %v1798_v8  ;;  %v1852_v62 = vpack.c.bf16 %v1312_v2, %v1312_v2 }
 0x260   :  { %3448 = vpow2.f32 %v1790_v6 }
 0x261   :  { %v3443_v7 = vpop.eup %3442  ;;  %3450 = vpow2.f32 %v1792_v9  ;;  %v2089_v9 = vsel %vm1857_vm3, %v1851_v41, 0 }
 0x262   :  { %v1801_v10 = vsel %vm1381_vm2, %v3443_v7, 0.0 }
 0x263   :  { %1802 = vadd.xlane.f32.xlu1 %v1801_v10  ;;  %v1770_v11 = vpop.xlane.xlu0 %1769 }
 0x264   :  { %v1773_v12 = vpop.xlane.xlu1 %1772  ;;  %v1780_v13 = vsub.f32 %v1698_v37, %v1770_v11 }
 0x265   :  { %v3445_v14 = vpop.eup %3444  ;;  %v1781_v15 = vsub.f32 %v1744_v38, %v1773_v12  ;;  %v1848_v38 = vpack.c.bf16 %v1152_v33, %v1152_v33 }
 0x266   :  { %v1794_v16 = vmul.f32 1.442695, %v1780_v13  ;;  %v1804_v17 = vsel %vm1381_vm2, %v3445_v14, 0.0  ;;  %v2135_v13 = vsel %vm1857_vm3, %v1852_v62, 0 }
 0x267   :  { %v1796_v18 = vmul.f32 1.442695, %v1781_v15  ;;  %1805 = vadd.xlane.f32.xlu0 %v1804_v17  ;;  %v1951_v45 = vsel %vm1857_vm3, %v1848_v38, 0 }
 0x268   :  { %3452 = vpow2.f32 %v1794_v16 }
 0x269   :  { %v4183_v21 = vpop.eup %3446  ;;  %3454 = vpow2.f32 %v1796_v18 }
 0x26a   :  { %v1807_v22 = vsel %vm1381_vm2, %v4183_v21, 0.0 }
 0x26b   :  { %1808 = vadd.xlane.f32.xlu1 %v1807_v22 }
 0x26d   :  { %v4187_v23 = vpop.eup %3448 }
 0x26e   :  { %v4189_v24 = vpop.eup %3450  ;;  %v1810_v25 = vsel %vm1381_vm2, %v4187_v23, 0.0 }
 0x26f   :  { %v1813_v26 = vsel %vm1381_vm2, %v4189_v24, 0.0  ;;  %1811 = vadd.xlane.f32.xlu0 %v1810_v25 }
 0x270   :  { %1814 = vadd.xlane.f32.xlu1 %v1813_v26 }
 0x275   :  { %v4195_v49 = vpop.eup %3452 }
 0x276   :  { %v4197_v50 = vpop.eup %3454  ;;  %v1816_v27 = vsel %vm1381_vm2, %v4195_v49, 0.0 }
 0x277   :  { %v1819_v28 = vsel %vm1381_vm2, %v4197_v50, 0.0  ;;  %1817 = vadd.xlane.f32.xlu0 %v1816_v27 }
 0x278   :  { %1820 = vadd.xlane.f32.xlu1 %v1819_v28  ;;  %v208_v28 = vld [vmem:[%s4420_s7 + $0x10] sm:$0xff] }
 0x2e8   :  { %v1800_v29 = vpop.xlane.xlu0 %1799 }
 0x2e9   :  { %3456 = vrcp.f32 %v1800_v29  ;;  %v216_v29 = vpack.c.bf16 %v208_v28, %v208_v28 }
 0x2eb   :  { %v2327_v33 = vsel %vm1857_vm3, %v216_v29, 0 }
 0x2ec   :  { %v1803_v30 = vpop.xlane.xlu1 %1802 }
 0x2ed   :  { %3458 = vrcp.f32 %v1803_v30  ;;  %v209_v30 = vld [vmem:[%s4420_s7 + $0x18] sm:$0xff] }
 0x2ee   :  { %v217_v19 = vpack.c.bf16 %v209_v30, %v209_v30 }
 0x2f0   :  { %v1806_v32 = vpop.xlane.xlu0 %1805  ;;  %v2373_v40 = vsel %vm1857_vm3, %v217_v19, 0 }
 0x2f1   :  { %3460 = vrcp.f32 %v1806_v32 }
 0x2f4   :  { %v1809_v36 = vpop.xlane.xlu1 %1808 }
 0x2f5   :  { %3462 = vrcp.f32 %v1809_v36 }
 0x2f6   :  { %v3457_v37 = vpop.eup %3456 }
 0x2f7   :  { %v1830_v34 = vmul.f32 %v3457_v37, %v3441_v4  ;;  %v2909_v4 = vld [vmem:[%s4419_s6 + $0x7] ss:$0 sm:$0xff] }
 0x2f8   :  { %v1812_v20 = vpop.xlane.xlu0 %1811  ;;  %v210_v37 = vld [vmem:[%s4420_s7 + $0x20] sm:$0xff] }
 0x2f9   :  { %v1815_v35 = vpop.xlane.xlu1 %1814  ;;  %3464 = vrcp.f32 %v1812_v20  ;;  %v1838_v44 = vpack.c.bf16 %v1830_v34, %v1830_v34  ;;  %v218_v20 = vpack.c.bf16 %v210_v37, %v210_v37 }
 0x2fa   :  { %v3459_v43 = vpop.eup %3458  ;;  %3466 = vrcp.f32 %v1815_v35 }
 0x2fb   :  { %3322 = vmatmul.mubr.msk.bf16.vlgmr.msra.gmra.mxu0 %vm1381_vm2, %v1838_v44  ;;  %v1831_v51 = vmul.f32 %v3459_v43, %v3443_v7  ;;  %v1352_v7 = vadd.f32 %v2909_v4, %v4170_v1  ;;  %v211_v43 = vld [vmem:[%s4420_s7 + $0x28] sm:$0xff] }
 0x2fc   :  { %3332 = vmatpush3.bf16.msra.mxu0 %v1951_v45  ;;  %3333 = vmatprep.mubr.msk.bf16.mxu0 %vm3505_vm0, %v3504_v3  ;;  %v219_v48 = vpack.c.bf16 %v211_v43, %v211_v43 }
 0x2fd   :  { %v1839_v52 = vpack.c.bf16 %v1831_v51, %v1831_v51  ;;  %3343 = vmatprep.subr.bf16.mxu0 %v3504_v3  ;;  %v2419_v51 = vsel %vm1857_vm3, %v218_v20, 0 }
 0x2fe   :  { %v3461_v53 = vpop.eup %3460  ;;  %v2465_v59 = vsel %vm1857_vm3, %v219_v48, 0 }
 0x2ff   :  { %3328 = vmatmul.mubr.msk.bf16.vlgmr.msra.gmra.mxu1 %vm1381_vm2, %v1839_v52  ;;  %v1832_v57 = vmul.f32 %v3461_v53, %v3445_v14  ;;  %v1853_v14 = vpack.c.bf16 %v1352_v7, %v1352_v7 }
 0x300   :  { %3338 = vmatpush3.bf16.msra.mxu1 %v1997_v55  ;;  %v1818_v60 = vpop.xlane.xlu0 %1817  ;;  %3339 = vmatprep.mubr.msk.bf16.mxu1 %vm3505_vm0, %v3504_v3  ;;  %v212_v55 = vld [vmem:[%s4420_s7 + $0x30] sm:$0xff] }
 0x301   :  { %v1821_v61 = vpop.xlane.xlu1 %1820  ;;  %3468 = vrcp.f32 %v1818_v60  ;;  %v1840_v63 = vpack.c.bf16 %v1832_v57, %v1832_v57  ;;  %3349 = vmatprep.subr.bf16.mxu1 %v3504_v3  ;;  %v2181_v17 = vsel %vm1857_vm3, %v1853_v14, 0  ;;  %v220_v60 = vpack.c.bf16 %v212_v55, %v212_v55 }
 0x302   :  { %v3463_v0 = vpop.eup %3462  ;;  %3470 = vrcp.f32 %v1821_v61 }
 0x303   :  { %3334 = vmatmul.mubr.msk.bf16.vlgmr.msra.gmra.mxu0 %vm1381_vm2, %v1840_v63  ;;  %v1833_v42 = vmul.f32 %v3463_v0, %v4183_v21  ;;  %v213_v0 = vld [vmem:[%s4420_s7 + $0x38] sm:$0xff] }
 0x304   :  { %3344 = vmatpush3.bf16.msra.mxu0 %v2043_v58  ;;  %3345 = vmatprep.mubr.msk.bf16.mxu0 %vm3505_vm0, %v3504_v3  ;;  %v221_v4 = vpack.c.bf16 %v213_v0, %v213_v0 }
 0x305   :  { %v1841_v5 = vpack.c.bf16 %v1833_v42, %v1833_v42  ;;  %3355 = vmatprep.subr.bf16.mxu0 %v3504_v3  ;;  %v2511_v42 = vsel %vm1857_vm3, %v220_v60, 0 }
 0x306   :  { %v3465_v6 = vpop.eup %3464  ;;  %v2557_v7 = vsel %vm1857_vm3, %v221_v4, 0 }
 0x307   :  { %v3467_v8 = vpop.eup %3466  ;;  %3340 = vmatmul.mubr.msk.bf16.vlgmr.msra.gmra.mxu1 %vm1381_vm2, %v1841_v5  ;;  %v1834_v10 = vmul.f32 %v3465_v6, %v4187_v23 }
 0x308   :  { %3350 = vmatpush3.bf16.msra.mxu1 %v2089_v9  ;;  %3351 = vmatprep.mubr.msk.bf16.mxu1 %vm3505_vm0, %v3504_v3  ;;  %v1835_v12 = vmul.f32 %v3467_v8, %v4189_v24  ;;  %v206_v24 = vld [vmem:[%s4420_s7] sm:$0xff] }
 0x309   :  { %v1842_v11 = vpack.c.bf16 %v1834_v10, %v1834_v10  ;;  %3361 = vmatprep.subr.bf16.mxu1 %v3504_v3  ;;  %v214_v25 = vpack.c.bf16 %v206_v24, %v206_v24 }
 0x30a   :  { %v1843_v1 = vpack.c.bf16 %v1835_v12, %v1835_v12 }
 0x30b   :  { %3346 = vmatmul.mubr.msk.bf16.vlgmr.msra.gmra.mxu0 %vm1381_vm2, %v1842_v11  ;;  %v2235_v26 = vsel %vm1857_vm3, %v214_v25, 0  ;;  %v2666_v25 = vld [vmem:[%s4422_s9 + $0x10] sm:$0xff] }
 0x30c   :  { %3356 = vmatpush3.bf16.msra.mxu0 %v2135_v13  ;;  %3357 = vmatprep.mubr.msk.bf16.mxu0 %vm3505_vm0, %v3504_v3 }
 0x30d   :  { %3367 = vmatprep.subr.bf16.mxu0 %v3504_v3 }
 0x30e   :  { %v3469_v15 = vpop.eup %3468 }
 0x30f   :  { %v3471_v16 = vpop.eup %3470  ;;  %3352 = vmatmul.mubr.msk.bf16.vlgmr.msra.gmra.mxu1 %vm1381_vm2, %v1843_v1  ;;  %v1836_v18 = vmul.f32 %v3469_v15, %v4195_v49  ;;  %v207_v49 = vld [vmem:[%s4420_s7 + $0x8] sm:$0xff] }
 0x310   :  { %3362 = vmatpush3.bf16.msra.mxu1 %v2181_v17  ;;  %3363 = vmatprep.mubr.msk.bf16.mxu1 %vm3505_vm0, %v3504_v3  ;;  %v1837_v22 = vmul.f32 %v3471_v16, %v4197_v50  ;;  %v215_v50 = vpack.c.bf16 %v207_v49, %v207_v49 }
 0x311   :  { %v1844_v21 = vpack.c.bf16 %v1836_v18, %v1836_v18  ;;  %3373 = vmatprep.subr.bf16.mxu1 %v3504_v3 }
 0x312   :  { %v1845_v23 = vpack.c.bf16 %v1837_v22, %v1837_v22  ;;  %v2281_v27 = vsel %vm1857_vm3, %v215_v50, 0  ;;  %v2664_v50 = vld [vmem:[%s4422_s9] sm:$0xff] }
 0x313   :  { %3358 = vmatmul.mubr.msk.bf16.vlgmr.msra.gmra.mxu0 %vm1381_vm2, %v1844_v21 }
 0x314   :  { %3369 = vmatprep.mubr.msk.bf16.mxu0 %vm3505_vm0, %v3504_v3  ;;  %3368 = vmatpush3.bf16.msra.mxu0 %v2235_v26  ;;  %v2667_v26 = vld [vmem:[%s4422_s9 + $0x18] sm:$0xff] }
 0x315   :  { %3379 = vmatprep.subr.bf16.mxu0 %v3504_v3  ;;  %v2669_v49 = vpack.c.bf16 %v2667_v26, %v2666_v25 }
 0x317   :  { %3364 = vmatmul.mubr.msk.bf16.vlgmr.msra.gmra.mxu1 %vm1381_vm2, %v1845_v23 }
 0x318   :  { %3375 = vmatprep.mubr.msk.bf16.mxu1 %vm3505_vm0, %v3504_v3  ;;  %3374 = vmatpush3.bf16.msra.mxu1 %v2281_v27  ;;  %v2665_v27 = vld [vmem:[%s4422_s9 + $0x8] sm:$0xff] }
 0x319   :  { %3385 = vmatprep.subr.bf16.mxu1 %v3504_v3  ;;  %v2668_v28 = vpack.c.bf16 %v2665_v27, %v2664_v50 }
 0x3bb   :  { %v1895_v31 = vpop.f32.mrf.mxu0 }
 0x3bc   :  { %v2223_v32 = vpack.c.bf16 %v1895_v31, %v1895_v31 }
 0x3bd   :  { %v3323_v36 = vpop.f32.mrf.mxu0 }
 0x3be   :  { %3370 = vmatmul.mubr.msk.bf16.vlgmr.msra.gmra.mxu0 %vm1381_vm2, %v2223_v32 }
 0x3bf   :  { %v1898_v38 = vpop.f32.mrf.mxu0  ;;  %v1941_v39 = vpop.f32.mrf.mxu1  ;;  %3380 = vmatpush3.bf16.msra.mxu0 %v2327_v33  ;;  %3381 = vmatprep.mubr.msk.bf16.mxu0 %vm3505_vm0, %v3504_v3 }
 0x3c0   :  { %v2224_v34 = vpack.c.bf16 %v1941_v39, %v1941_v39  ;;  %3391 = vmatprep.subr.bf16.mxu0 %v3504_v3 }
 0x3c1   :  { %v3324_v35 = vpop.f32.mrf.mxu0  ;;  %v3329_v44 = vpop.f32.mrf.mxu1 }
 0x3c2   :  { %3376 = vmatmul.mubr.msk.bf16.vlgmr.msra.gmra.mxu1 %vm1381_vm2, %v2224_v34 }
 0x3c3   :  { %v1944_v45 = vpop.f32.mrf.mxu1  ;;  %v1987_v46 = vpop.f32.mrf.mxu0  ;;  %3386 = vmatpush3.bf16.msra.mxu1 %v2373_v40  ;;  %3387 = vmatprep.mubr.msk.bf16.mxu1 %vm3505_vm0, %v3504_v3 }
 0x3c4   :  { %v2225_v47 = vpack.c.bf16 %v1987_v46, %v1987_v46  ;;  %3397 = vmatprep.subr.bf16.mxu1 %v3504_v3 }
 0x3c5   :  { %v3330_v52 = vpop.f32.mrf.mxu1  ;;  %v3335_v53 = vpop.f32.mrf.mxu0 }
 0x3c6   :  { %3382 = vmatmul.mubr.msk.bf16.vlgmr.msra.gmra.mxu0 %vm1381_vm2, %v2225_v47 }
 0x3c7   :  { %v1990_v56 = vpop.f32.mrf.mxu0  ;;  %v2033_v54 = vpop.f32.mrf.mxu1  ;;  %3392 = vmatpush3.bf16.msra.mxu0 %v2419_v51  ;;  %3393 = vmatprep.mubr.msk.bf16.mxu0 %vm3505_vm0, %v3504_v3 }
 0x3c8   :  { %v2226_v57 = vpack.c.bf16 %v2033_v54, %v2033_v54  ;;  %3403 = vmatprep.subr.bf16.mxu0 %v3504_v3 }
 0x3c9   :  { %v3336_v61 = vpop.f32.mrf.mxu0  ;;  %v3341_v63 = vpop.f32.mrf.mxu1 }
 0x3ca   :  { %3388 = vmatmul.mubr.msk.bf16.vlgmr.msra.gmra.mxu1 %vm1381_vm2, %v2226_v57  ;;  %v2942_v57 = vld [vmem:[%s4421_s8] ss:$0 sm:$0xff] }
 0x3cb   :  { %v2036_v58 = vpop.f32.mrf.mxu1  ;;  %v2079_v41 = vpop.f32.mrf.mxu0  ;;  %3398 = vmatpush3.bf16.msra.mxu1 %v2465_v59  ;;  %3399 = vmatprep.mubr.msk.bf16.mxu1 %vm3505_vm0, %v3504_v3 }
 0x3cc   :  { %v2227_v2 = vpack.c.bf16 %v2079_v41, %v2079_v41  ;;  %3409 = vmatprep.subr.bf16.mxu1 %v3504_v3 }
 0x3cd   :  { %v3342_v5 = vpop.f32.mrf.mxu1  ;;  %v3347_v6 = vpop.f32.mrf.mxu0 }
 0x3ce   :  { %3394 = vmatmul.mubr.msk.bf16.vlgmr.msra.gmra.mxu0 %vm1381_vm2, %v2227_v2  ;;  %v3480_v6 = vld [vmem:[%s4436_s29] sm:$0xff] }
 0x3cf   :  { %v2082_v8 = vpop.f32.mrf.mxu0  ;;  %v2125_v9 = vpop.f32.mrf.mxu1  ;;  %3404 = vmatpush3.bf16.msra.mxu0 %v2511_v42  ;;  %3405 = vmatprep.mubr.msk.bf16.mxu0 %vm3505_vm0, %v3504_v3 }
 0x3d0   :  { %v2228_v62 = vpack.c.bf16 %v2125_v9, %v2125_v9  ;;  %3415 = vmatprep.subr.bf16.mxu0 %v3504_v3 }
 0x3d1   :  { %v3348_v10 = vpop.f32.mrf.mxu0  ;;  %v3353_v11 = vpop.f32.mrf.mxu1 }
 0x3d2   :  { %3400 = vmatmul.mubr.msk.bf16.vlgmr.msra.gmra.mxu1 %vm1381_vm2, %v2228_v62 }
 0x3d3   :  { %v2128_v12 = vpop.f32.mrf.mxu1  ;;  %v2171_v13 = vpop.f32.mrf.mxu0  ;;  %3410 = vmatpush3.bf16.msra.mxu1 %v2557_v7  ;;  %3411 = vmatprep.mubr.msk.bf16.mxu1 %vm3505_vm0, %v3504_v3  ;;  %v3481_v7 = vld [vmem:[%s4436_s29 + $0x8] sm:$0xff]  ;;  %s3506_s29 = smov [#allocation2]  }
 0x3d4   :  { %v2229_v14 = vpack.c.bf16 %v2171_v13, %v2171_v13  ;;  %3423 = vmatprep.subr.bf16.mxu1 %v3504_v3  ;;  %s2859_s25 = sshll.u32 %s3506_s29, 4  ;;  %s2860_s25 = int_to_ptr.vmem [resolvable:$true] %s2859_s25 }
 0x3d5   :  { %v3354_v1 = vpop.f32.mrf.mxu1  ;;  %v3359_v15 = vpop.f32.mrf.mxu0  ;;  %s3482_s27 = scalar_lea.vmem %s2860_s25, 256  ;;  %p3487_p1 = scmp.lt.s32.totalorder %s2860_s25, %s2860_s25 }
 0x3d6   :  { %3406 = vmatmul.mubr.msk.bf16.vlgmr.msra.gmra.mxu0 %vm1381_vm2, %v2229_v14  ;;  %p3483_p0 = scmp.ne.s32.totalorder %s2860_s25, %s3482_s27  ;;  %p3488_p2 = scmp.lt.s32.totalorder %s3482_s27, %s3482_s27 }
 0x3d7   :  { %v2174_v16 = vpop.f32.mrf.mxu0  ;;  %v2217_v17 = vpop.f32.mrf.mxu1  ;;  %3419 = vmatprep.mubr.msk.bf16.mxu0 %vm3505_vm0, %v3504_v3  ;;  %3416 = vmatpush3.bf16.msra.mxu0 %v2669_v49 }
 0x3d8   :  { %v2230_v18 = vpack.c.bf16 %v2217_v17, %v2217_v17  ;;  %3417 = vmatprep.subr.bf16.mxu0 %v3504_v3  ;;  %p3489_p3 = por %p3488_p2, %p3487_p1 }
 0x3d9   :  { %v3360_v21 = vpop.f32.mrf.mxu0  ;;  %v3365_v22 = vpop.f32.mrf.mxu1 }
 0x3da   :  { %3412 = vmatmul.mubr.msk.bf16.vlgmr.msra.gmra.mxu1 %vm1381_vm2, %v2230_v18  ;;  %p3490_p4 = pnand %p3489_p3, %p3483_p0 }
 0x3db   :  { %v2220_v23 = vpop.f32.mrf.mxu1  ;;  %3431 = vmatprep.mubr.msk.bf16.mxu1 %vm3505_vm0, %v3504_v3  ;;  %3418 = vmatpush3.bf16.msra.mxu0 %v2668_v28 }
 0x3dd   :  { %v3366_v24 = vpop.f32.mrf.mxu1 }
 0x47e   :  { %v2271_v29 = vpop.f32.mrf.mxu0 }
 0x480   :  { %v3371_v30 = vpop.f32.mrf.mxu0 }
 0x482   :  { %v2274_v31 = vpop.f32.mrf.mxu0  ;;  %v2317_v32 = vpop.f32.mrf.mxu1 }
 0x484   :  { %v3372_v33 = vpop.f32.mrf.mxu0  ;;  %v3377_v19 = vpop.f32.mrf.mxu1 }
 0x486   :  { %v2320_v36 = vpop.f32.mrf.mxu1  ;;  %v2363_v37 = vpop.f32.mrf.mxu0 }
 0x487   :  { %v2599_v48 = vadd.f32 %v2363_v37, %v2271_v29 }
 0x488   :  { %v3378_v38 = vpop.f32.mrf.mxu1  ;;  %v3383_v39 = vpop.f32.mrf.mxu0 }
 0x489   :  { %v2943_v38 = vld [vmem:[%s4426_s13] ss:$0 sm:$0xff] }
 0x48a   :  { %v2366_v34 = vpop.f32.mrf.mxu0  ;;  %v2409_v40 = vpop.f32.mrf.mxu1 }
 0x48b   :  { %v2600_v59 = vadd.f32 %v2409_v40, %v2317_v32  ;;  %v2944_v40 = vld [vmem:[%s4427_s14] ss:$0 sm:$0xff] }
 0x48c   :  { %v3384_v20 = vpop.f32.mrf.mxu0  ;;  %v3389_v35 = vpop.f32.mrf.mxu1 }
 0x48e   :  { %v2412_v44 = vpop.f32.mrf.mxu1  ;;  %v2455_v43 = vpop.f32.mrf.mxu0 }
 0x48f   :  { %v2601_v55 = vadd.f32 %v2599_v48, %v2455_v43  ;;  %v2744_v48 = vld [vmem:[%s4424_s11 + $0x20] sm:$0xff] }
 0x490   :  { %v3390_v45 = vpop.f32.mrf.mxu1  ;;  %v3395_v46 = vpop.f32.mrf.mxu0 }
 0x491   :  { %v2746_v46 = vld [vmem:[%s4424_s11 + $0x30] sm:$0xff] }
 0x492   :  { %v2458_v47 = vpop.f32.mrf.mxu0  ;;  %v2501_v51 = vpop.f32.mrf.mxu1 }
 0x493   :  { %v2602_v0 = vadd.f32 %v2600_v59, %v2501_v51  ;;  %v2747_v47 = vld [vmem:[%s4424_s11 + $0x38] sm:$0xff]  ;;  %v2741_v59 = vld [vmem:[%s4424_s11 + $0x8] sm:$0xff] }
 0x494   :  { %v3396_v52 = vpop.f32.mrf.mxu0  ;;  %v3401_v53 = vpop.f32.mrf.mxu1  ;;  %v2751_v51 = vpack.c.bf16 %v2747_v47, %v2746_v46 }
 0x495   :  { %v2745_v52 = vld [vmem:[%s4424_s11 + $0x28] sm:$0xff] }
 0x496   :  { %v2504_v56 = vpop.f32.mrf.mxu1  ;;  %v2547_v54 = vpop.f32.mrf.mxu0  ;;  %3424 = vmatpush3.bf16.msra.mxu1 %v2751_v51  ;;  %v2750_v53 = vpack.c.bf16 %v2745_v52, %v2744_v48 }
 0x497   :  { %v2603_v60 = vadd.f32 %v2601_v55, %v2547_v54  ;;  %3425 = vmatprep.subr.bf16.mxu1 %v3504_v3  ;;  %v2742_v55 = vld [vmem:[%s4424_s11 + $0x10] sm:$0xff]  ;;  %v2743_v56 = vld [vmem:[%s4424_s11 + $0x18] sm:$0xff] }
 0x498   :  { %v3402_v61 = vpop.f32.mrf.mxu1  ;;  %v3407_v63 = vpop.f32.mrf.mxu0  ;;  %v2749_v54 = vpack.c.bf16 %v2743_v56, %v2742_v55 }
 0x499   :  { %v2612_v58 = vadd.f32 %v2942_v57, %v2603_v60  ;;  %v2945_v61 = vld [vmem:[%s4423_s10] ss:$0 sm:$0xff] }
 0x49a   :  { %v2550_v41 = vpop.f32.mrf.mxu0  ;;  %v2593_v2 = vpop.f32.mrf.mxu1  ;;  %3426 = vmatpush3.bf16.msra.mxu1 %v2750_v53 }
 0x49b   :  { %v2604_v42 = vadd.f32 %v2602_v0, %v2593_v2  ;;  %v2614_v8 = vadd.f32 %v3480_v6, %v2612_v58  ;;  %3427 = vmatprep.subr.bf16.mxu1 %v3504_v3 }
 0x49c   :  { %v3408_v4 = vpop.f32.mrf.mxu0  ;;  %v3413_v5 = vpop.f32.mrf.mxu1 }
 0x49d   :  { %v2613_v9 = vadd.f32 %v2942_v57, %v2604_v42  ;;  %v2616_v12 = vsel %vm278_vm1, %v2614_v8, 0.0  ;;  %v2740_v57 = vld [vmem:[%s4424_s11] sm:$0xff] }
 0x49e   :  { %v2596_v62 = vpop.f32.mrf.mxu1  ;;  %3428 = vmatpush3.bf16.msra.mxu1 %v2749_v54  ;;  %v2748_v60 = vpack.c.bf16 %v2741_v59, %v2740_v57  ;;  %v2949_v57 = vld [vmem:[%s4428_s15] ss:$0 sm:$0xff] }
 0x49f   :  { %v2615_v10 = vadd.f32 %v3481_v7, %v2613_v9  ;;  %3429 = vmatprep.subr.bf16.mxu1 %v3504_v3 }
 0x4a0   :  { %v3414_v11 = vpop.f32.mrf.mxu1 }
 0x4a1   :  { %v2617_v13 = vsel %vm278_vm1, %v2615_v10, 0.0 }
 0x4a2   :  { %v2618_v14 = vadd.f32 %v2617_v13, %v2616_v12  ;;  %3430 = vmatpush3.bf16.msra.mxu1 %v2748_v60 }
 0x4a4   :  { %v2619_v1 = vrot.slane %v2618_v14, 4 }
 0x4a6   :  { %v2620_v15 = vadd.f32 %v2619_v1, %v2618_v14 }
 0x4a8   :  { %v2621_v16 = vrot.slane %v2620_v15, 2 }
 0x4aa   :  { %v2622_v17 = vadd.f32 %v2621_v16, %v2620_v15 }
 0x4ac   :  { %v2623_v18 = vrot.slane %v2622_v17, 1 }
 0x4ae   :  { %v2624_v21 = vadd.f32 %v2623_v18, %v2622_v17 }
 0x4b0   :  { %v2626_v22 = vmul.f32 0.0625, %v2624_v21 }
 0x4b2   :  { %v2627_v23 = vsub.f32 %v2614_v8, %v2626_v22  ;;  %v2628_v24 = vsub.f32 %v2615_v10, %v2626_v22  ;;  %v2947_v22 = vld [vmem:[%s4425_s12] ss:$0 sm:$0xff] }
 0x4b4   :  { %v2629_v25 = vmul.f32 %v2627_v23, %v2627_v23  ;;  %v2630_v26 = vmul.f32 %v2628_v24, %v2628_v24 }
 0x4b6   :  { %v2631_v49 = vsel %vm278_vm1, %v2629_v25, 0.0  ;;  %v2632_v50 = vsel %vm278_vm1, %v2630_v26, 0.0 }
 0x4b7   :  { %v2633_v27 = vadd.f32 %v2632_v50, %v2631_v49 }
 0x4b9   :  { %v2634_v28 = vrot.slane %v2633_v27, 4 }
 0x4bb   :  { %v2635_v29 = vadd.f32 %v2634_v28, %v2633_v27 }
 0x4bd   :  { %v2636_v30 = vrot.slane %v2635_v29, 2 }
 0x4bf   :  { %v2637_v31 = vadd.f32 %v2636_v30, %v2635_v29 }
 0x4c1   :  { %v2638_v32 = vrot.slane %v2637_v31, 1 }
 0x4c3   :  { %v2639_v33 = vadd.f32 %v2638_v32, %v2637_v31 }
 0x4c5   :  { %v2640_v19 = vmul.f32 0.0625, %v2639_v33 }
 0x4c7   :  { %v2641_v36 = vadd.f32 1e-05, %v2640_v19 }
 0x4c9   :  { %3472 = vrsqrt.f32 %v2641_v36 }
 0x4d6   :  { %v3473_v37 = vpop.eup %3472 }
 0x4d7   :  { %v2643_v39 = vmul.f32 %v3473_v37, %v2627_v23  ;;  %v2644_v34 = vmul.f32 %v3473_v37, %v2628_v24 }
 0x4d9   :  { %v2652_v20 = vmul.f32 %v2943_v38, %v2643_v39  ;;  %v2653_v35 = vmul.f32 %v2943_v38, %v2644_v34 }
 0x4db   :  { %v2662_v44 = vadd.f32 %v2944_v40, %v2653_v35  ;;  %v2661_v43 = vadd.f32 %v2944_v40, %v2652_v20 }
 0x4dd   :  { %v2663_v45 = vpack.c.bf16 %v2662_v44, %v2661_v43 }
 0x4df   :  { %3420 = vmatmul.mubr.msk.bf16.vlgmr.msra.gmra.mxu0 %vm278_vm1, %v2663_v45 }
 0x59f   :  { %v2714_v63 = vpop.f32.mrf.mxu0 }
 0x5a0   :  { %v2715_v0 = vadd.f32 %v2945_v61, %v2714_v63 }
 0x5a1   :  { %v3421_v58 = vpop.f32.mrf.mxu0 }
 0x5a2   :  { %v2723_v41 = vmul.f32 %v2715_v0, %v2715_v0  ;;  %v2721_v1 = vmul.f32 0.5, %v2715_v0 }
 0x5a3   :  { %v2717_v2 = vpop.f32.mrf.mxu0 }
 0x5a4   :  { %v2725_v3 = vmul.f32 %v2723_v41, %v2715_v0  ;;  %v2718_v42 = vadd.f32 %v2945_v61, %v2717_v2  ;;  %v2950_v61 = vld [vmem:[%s4429_s16] ss:$0 sm:$0xff] }
 0x5a5   :  { %v3422_v4 = vpop.f32.mrf.mxu0 }
 0x5a6   :  { %v2727_v5 = vmul.f32 0.044715, %v2725_v3  ;;  %v2724_v6 = vmul.f32 %v2718_v42, %v2718_v42  ;;  %v2722_v15 = vmul.f32 0.5, %v2718_v42 }
 0x5a8   :  { %v2729_v8 = vadd.f32 %v2727_v5, %v2715_v0  ;;  %v2726_v9 = vmul.f32 %v2724_v6, %v2718_v42 }
 0x5aa   :  { %v2731_v62 = vmul.f32 0.7978846, %v2729_v8  ;;  %v2728_v7 = vmul.f32 0.044715, %v2726_v9 }
 0x5ac   :  { %3474 = vtanh.f32 %v2731_v62  ;;  %v2730_v10 = vadd.f32 %v2728_v7, %v2718_v42 }
 0x5ae   :  { %v2732_v11 = vmul.f32 0.7978846, %v2730_v10 }
 0x5b0   :  { %3476 = vtanh.f32 %v2732_v11 }
 0x5b9   :  { %v3475_v12 = vpop.eup %3474 }
 0x5ba   :  { %v2735_v13 = vadd.f32 1.0, %v3475_v12 }
 0x5bc   :  { %v2737_v17 = vmul.f32 %v2735_v13, %v2721_v1 }
 0x5bd   :  { %v3477_v14 = vpop.eup %3476 }
 0x5be   :  { %v2736_v16 = vadd.f32 1.0, %v3477_v14 }
 0x5c0   :  { %v2738_v18 = vmul.f32 %v2736_v16, %v2722_v15 }
 0x5c2   :  { %v2739_v21 = vpack.c.bf16 %v2738_v18, %v2737_v17 }
 0x5c4   :  { %3432 = vmatmul.mubr.msk.bf16.vlgmr.msra.gmra.mxu1 %vm2759_vm4, %v2739_v21 }
 0x684   :  { %v2797_v23 = vpop.f32.mrf.mxu1 }
 0x685   :  { %v2798_v24 = vadd.f32 %v2947_v22, %v2797_v23 }
 0x686   :  { %v3433_v25 = vpop.f32.mrf.mxu1 }
 0x687   :  { %v2804_v49 = vadd.f32 %v2798_v24, %v2661_v43 }
 0x688   :  { %v2800_v26 = vpop.f32.mrf.mxu1 }
 0x689   :  { %v2801_v50 = vadd.f32 %v2947_v22, %v2800_v26  ;;  %v2806_v29 = vsel %vm278_vm1, %v2804_v49, 0.0 }
 0x68a   :  { %v3434_v27 = vpop.f32.mrf.mxu1 }
 0x68b   :  { %v2805_v28 = vadd.f32 %v2801_v50, %v2662_v44 }
 0x68d   :  { %v2807_v30 = vsel %vm278_vm1, %v2805_v28, 0.0 }
 0x68e   :  { %v2808_v31 = vadd.f32 %v2807_v30, %v2806_v29 }
 0x690   :  { %v2809_v32 = vrot.slane %v2808_v31, 4 }
 0x692   :  { %v2810_v33 = vadd.f32 %v2809_v32, %v2808_v31 }
 0x694   :  { %v2811_v19 = vrot.slane %v2810_v33, 2 }
 0x696   :  { %v2812_v36 = vadd.f32 %v2811_v19, %v2810_v33 }
 0x698   :  { %v2813_v37 = vrot.slane %v2812_v36, 1 }
 0x69a   :  { %v2814_v38 = vadd.f32 %v2813_v37, %v2812_v36 }
 0x69c   :  { %v2815_v39 = vmul.f32 0.0625, %v2814_v38 }
 0x69e   :  { %v2816_v34 = vsub.f32 %v2804_v49, %v2815_v39  ;;  %v2817_v40 = vsub.f32 %v2805_v28, %v2815_v39 }
 0x6a0   :  { %v2818_v20 = vmul.f32 %v2816_v34, %v2816_v34  ;;  %v2819_v35 = vmul.f32 %v2817_v40, %v2817_v40 }
 0x6a2   :  { %v2820_v43 = vsel %vm278_vm1, %v2818_v20, 0.0  ;;  %v2821_v44 = vsel %vm278_vm1, %v2819_v35, 0.0 }
 0x6a3   :  { %v2822_v45 = vadd.f32 %v2821_v44, %v2820_v43 }
 0x6a5   :  { %v2823_v46 = vrot.slane %v2822_v45, 4 }
 0x6a7   :  { %v2824_v47 = vadd.f32 %v2823_v46, %v2822_v45 }
 0x6a9   :  { %v2825_v51 = vrot.slane %v2824_v47, 2 }
 0x6ab   :  { %v2826_v48 = vadd.f32 %v2825_v51, %v2824_v47 }
 0x6ad   :  { %v2827_v52 = vrot.slane %v2826_v48, 1 }
 0x6af   :  { %v2828_v53 = vadd.f32 %v2827_v52, %v2826_v48 }
 0x6b1   :  { %v2829_v55 = vmul.f32 0.0625, %v2828_v53 }
 0x6b3   :  { %v2830_v56 = vadd.f32 1e-05, %v2829_v55 }
 0x6b5   :  { %3478 = vrsqrt.f32 %v2830_v56 }
 0x6c2   :  { %v3479_v54 = vpop.eup %3478 }
 0x6c3   :  { %v2832_v59 = vmul.f32 %v3479_v54, %v2816_v34  ;;  %v2833_v60 = vmul.f32 %v3479_v54, %v2817_v40 }
 0x6c5   :  { %v2841_v63 = vmul.f32 %v2949_v57, %v2832_v59  ;;  %v2842_v0 = vmul.f32 %v2949_v57, %v2833_v60 }
 0x6c7   :  { %v2850_v58 = vadd.f32 %v2950_v61, %v2841_v63  ;;  %v2851_v41 = vadd.f32 %v2950_v61, %v2842_v0 }
 0x6c9   :  { %2852 = vst.msk [vmem:[#allocation2] sm:$0xff] %vm278_vm1, %v2850_v58  ;;  %2853 = vst.msk [vmem:[#allocation2 + $0x8] sm:$0xff] %vm278_vm1, %v2851_v41 }
 0x6ca   :  { %3493 = shalt.err (!%p3490_p4)
}
 0x6cb   :  { %s3507_s15 = smov 128   ;;  %s3508_s16 = smov 8  }
 0x6cc   :  { %2865 = dma.vmem_to_hbm [thread:$0]  %s2860_s25, 256, %s4430_s17, [#allocation3], %s3507_s15, %s3507_s15, %s3508_s16  }
 0x6cd   :  { %3502 = dma.done.wait [#allocation3], 256  }
 0x6ce   :  { %3503 = vsyncadd [#allocation3], 4294967040 }
 0x6cf   :  { %2869 = vsyncpa [#allocation3], 1 }

</bundles_post_ra>
